<compile_context>
chip_gen: v7x
topology: tpu7x:2x2x1
jax: 0.10.0
libtpu: 0.0.40
codegen_flags: <defaults>
</compile_context>

<pallas_src>
import functools

import jax
import jax.numpy as jnp
from jax.experimental import pallas as pl
from jax.experimental.pallas import tpu as pltpu


def _vmem_limit_bytes():
    """Scoped-VMEM limit: ~80% of physical capacity (fallback 128 MiB chips)."""
    cap = 128 * 1024 * 1024
    try:
        info = pltpu.get_tpu_info()
        cap = int(getattr(info, "vmem_capacity_bytes", cap))
    except Exception:
        pass
    return max(32 * 1024 * 1024, int(cap * 0.8))


def _tha_kernel(*refs, num_heads, head_dim, scale, compute_dtype,
                exact_softmax, has_im, has_mask, return_attn):
    """One (batch, query-tile) per grid step.

    Ref order: x_full, [int_matrix], [mask_add], W_q, b_q, W_kv, b_kv,
    W_l, b_l, W_w, b_w, W_proj, b_proj, out, [attn], kv_scratch.
    """
    it = iter(refs)
    x_ref = next(it)                               # (1, N, C)  input dtype
    im_ref = next(it) if has_im else None          # (1, H, TQ, N) stream dtype
    mask_ref = next(it) if has_mask else None      # (1, TQ, N) additive, stream dtype
    wq_ref = next(it)                              # (C, C)   compute dtype
    bq_ref = next(it)                              # (1, C)   f32
    wkv_ref = next(it)                             # (C, 2C)  compute dtype
    bkv_ref = next(it)                             # (1, 2C)  f32
    wl_ref = next(it)                              # (H, H)   compute dtype
    bl_ref = next(it)                              # (H, 1)   f32
    ww_ref = next(it)                              # (H, H)   compute dtype
    bw_ref = next(it)                              # (H, 1)   f32
    wp_ref = next(it)                              # (C, C)   compute dtype
    bp_ref = next(it)                              # (1, C)   f32
    out_ref = next(it)                             # (1, TQ, C)
    attn_ref = next(it) if return_attn else None   # (1, H, TQ, N)
    kv_ref = next(it)                              # (2, H, N, dh) scratch, compute dtype

    H, dh = num_heads, head_dim
    cdt = compute_dtype
    n = x_ref.shape[1]
    c = x_ref.shape[2]
    tq = out_ref.shape[1]
    qi = pl.program_id(1)

    # --- K/V projection over the full sequence, once per batch element -------
    # Stored head-major (H, N, dh) so the per-q-tile steps do no K/V relayout.
    @pl.when(qi == 0)
    def _():
        xf = x_ref[0].astype(cdt)                                   # (N, C)
        kv = jnp.dot(xf, wkv_ref[...],
                     preferred_element_type=jnp.float32) + bkv_ref[...]   # (N, 2C) f32
        k = jnp.swapaxes(kv[:, :c].reshape(n, H, dh), 0, 1)         # (H, N, dh)
        v = jnp.swapaxes(kv[:, c:].reshape(n, H, dh), 0, 1)         # (H, N, dh)
        kv_ref[0] = k.astype(kv_ref.dtype)
        kv_ref[1] = v.astype(kv_ref.dtype)

    # --- Q projection for this query tile (sliced from resident full block) --
    q_start = pl.multiple_of(qi * tq, tq)
    xq = x_ref[0, pl.ds(q_start, tq), :].astype(cdt)                # (TQ, C)
    q = jnp.dot(xq, wq_ref[...],
                preferred_element_type=jnp.float32) + bq_ref[...]   # (TQ, C) f32
    q = q * scale
    qh = jnp.swapaxes(q.astype(cdt).reshape(tq, H, dh), 0, 1)       # (H, TQ, dh)

    kh = kv_ref[0]                                                  # (H, N, dh)
    vh = kv_ref[1]                                                  # (H, N, dh)

    # --- per-head logits: (scale*q) @ k^T (batched MXU contraction) ----------
    logits = jnp.einsum('hqd,hkd->hqk', qh, kh,
                        preferred_element_type=jnp.float32)         # (H, TQ, N) f32
    if has_im:
        logits = logits + im_ref[0].astype(jnp.float32)

    # --- talking-heads mix before softmax (proj_l), MXU in compute dtype -----
    mixed = jnp.dot(wl_ref[...], logits.astype(cdt).reshape(H, tq * n),
                    preferred_element_type=jnp.float32) + bl_ref[...]
    mixed = mixed.reshape(H, tq, n)                                 # (H, TQ, N) f32
    if has_mask:
        # additive mask precomputed host-side: (mask-1)*1e9 == (1-mask)*(-1e9)
        mixed = mixed + mask_ref[0].astype(jnp.float32)[None, :, :]

    # --- softmax over keys (f32) ----------------------------------------------
    m = jnp.max(mixed, axis=-1, keepdims=True)
    e = jnp.exp(mixed - m)
    denom = jnp.sum(e, axis=-1, keepdims=True)
    if exact_softmax:
        probs = e / denom
    else:
        probs = e * pl.reciprocal(denom, approx=True)               # EUP slot

    # --- talking-heads mix after softmax (proj_w); attn_drop = identity ------
    attn = jnp.dot(ww_ref[...], probs.astype(cdt).reshape(H, tq * n),
                   preferred_element_type=jnp.float32) + bw_ref[...]
    attn = attn.reshape(H, tq, n)                                   # (H, TQ, N) f32
    if return_attn:
        attn_ref[0] = attn.astype(attn_ref.dtype)

    # --- context: attn @ v (batched over heads) -------------------------------
    ctx = jnp.einsum('hqk,hkd->hqd', attn.astype(cdt), vh,
                     preferred_element_type=jnp.float32)            # (H, TQ, dh)
    o = jnp.swapaxes(ctx, 0, 1).reshape(tq, c).astype(cdt)          # (TQ, C)

    # --- output projection; proj_drop = identity ------------------------------
    out = jnp.dot(o, wp_ref[...],
                  preferred_element_type=jnp.float32) + bp_ref[...]
    out_ref[0] = out.astype(out_ref.dtype)


def talking_head_attention(x, params, int_matrix=None, mask=None, *,
                           num_heads, compute_dtype=jnp.bfloat16,
                           return_attn=True, tq=None):
    """Pallas wrapper. Returns (out, attn) like the PyTorch module, or just
    `out` if return_attn=False (skips the (B,H,N,N) writeback entirely)."""
    B, N, C = x.shape
    H = num_heads
    dh = C // H
    scale = dh ** -0.5
    wqkv, bqkv, wl, bl, ww, bw, wp, bp = params

    # Query-tile size: lane/sublane friendly when N is a 128 multiple,
    # otherwise a single full-sequence tile (demo shapes).
    if tq is None:
        tq = 128 if (N % 128 == 0) else N
    assert N % tq == 0, "query tile must divide N (pad N for real workloads)"
    nq = N // tq

    has_im = int_matrix is not None
    has_mask = mask is not None
    exact = bool(compute_dtype == jnp.float32)
    cdt = compute_dtype
    f32 = jnp.float32
    # HBM streaming dtype for int_matrix / additive mask / attn output.
    stream_dtype = f32 if exact else cdt
    attn_dtype = f32 if exact else cdt

    # --- host-side weight prep (one-time): cast to compute dtype, split qkv ---
    wq_c = wqkv[:, :C].astype(cdt)            # (C, C)
    wkv_c = wqkv[:, C:].astype(cdt)           # (C, 2C)
    bq_r = bqkv[:, :C].astype(f32)            # (1, C)
    bkv_r = bqkv[:, C:].astype(f32)           # (1, 2C)
    wl_c = wl.astype(cdt)                     # (H, H)
    ww_c = ww.astype(cdt)
    bl_col = jnp.reshape(bl, (H, 1)).astype(f32)
    bw_col = jnp.reshape(bw, (H, 1)).astype(f32)
    wp_c = wp.astype(cdt)                     # (C, C)
    bp_r = bp.astype(f32)                     # (1, C)

    kern = functools.partial(
        _tha_kernel, num_heads=H, head_dim=dh, scale=scale,
        compute_dtype=cdt, exact_softmax=exact,
        has_im=has_im, has_mask=has_mask, return_attn=return_attn)

    in_specs = [pl.BlockSpec((1, N, C), lambda b, q: (b, 0, 0))]   # x (full seq)
    inputs = [x]
    if has_im:
        in_specs.append(pl.BlockSpec((1, H, tq, N), lambda b, q: (b, 0, q, 0)))
        inputs.append(int_matrix.astype(stream_dtype))
    if has_mask:
        in_specs.append(pl.BlockSpec((1, tq, N), lambda b, q: (b, q, 0)))
        inputs.append(((mask.astype(f32) - 1.0) * 1e9).astype(stream_dtype))

    const2 = lambda b, q: (0, 0)
    in_specs += [
        pl.BlockSpec((C, C), const2),       # W_q
        pl.BlockSpec((1, C), const2),       # b_q
        pl.BlockSpec((C, 2 * C), const2),   # W_kv
        pl.BlockSpec((1, 2 * C), const2),   # b_kv
        pl.BlockSpec((H, H), const2),       # W_l
        pl.BlockSpec((H, 1), const2),       # b_l
        pl.BlockSpec((H, H), const2),       # W_w
        pl.BlockSpec((H, 1), const2),       # b_w
        pl.BlockSpec((C, C), const2),       # W_proj
        pl.BlockSpec((1, C), const2),       # b_proj
    ]
    inputs += [wq_c, bq_r, wkv_c, bkv_r, wl_c, bl_col, ww_c, bw_col, wp_c, bp_r]

    out_shapes = [jax.ShapeDtypeStruct((B, N, C), jnp.float32)]
    out_specs = [pl.BlockSpec((1, tq, C), lambda b, q: (b, q, 0))]
    if return_attn:
        out_shapes.append(jax.ShapeDtypeStruct((B, H, N, N), attn_dtype))
        out_specs.append(pl.BlockSpec((1, H, tq, N), lambda b, q: (b, 0, q, 0)))

    results = pl.pallas_call(
        kern,
        out_shape=tuple(out_shapes),
        grid_spec=pltpu.PrefetchScalarGridSpec(
            num_scalar_prefetch=0,
            grid=(B, nq),
            in_specs=in_specs,
            out_specs=out_specs,
            # K/V for the whole sequence, computed at q-tile 0 in head-major
            # layout and reused across the (sequential, "arbitrary") q axis.
            scratch_shapes=[pltpu.VMEM((2, H, N, dh), cdt)],
        ),
        compiler_params=pltpu.CompilerParams(
            dimension_semantics=("parallel", "arbitrary"),
            vmem_limit_bytes=_vmem_limit_bytes()),
    )(*inputs)

    if return_attn:
        return results[0], results[1]
    return results[0]


def tha_reference(x, params, int_matrix, mask, *, num_heads):
    """Pure-JAX reference mirroring the PyTorch forward (eval mode)."""
    wqkv, bqkv, wl, bl, ww, bw, wp, bp = params
    B, N, C = x.shape
    H = num_heads
    dh = C // H
    scale = dh ** -0.5
    qkv = x @ wqkv + bqkv[0]                                       # (B, N, 3C)
    qkv = qkv.reshape(B, N, 3, H, dh).transpose(2, 0, 3, 1, 4)     # (3, B, H, N, dh)
    q, k, v = qkv[0] * scale, qkv[1], qkv[2]
    attn = jnp.einsum('bhnd,bhmd->bhnm', q, k)
    attn = attn + int_matrix
    attn = jnp.einsum('bhnm,gh->bgnm', attn, wl) + bl[0][None, :, None, None]
    attn = attn + ((1.0 - mask) * -1e9)[:, None, :, :]
    attn = jax.nn.softmax(attn, axis=-1)
    attn = jnp.einsum('bhnm,gh->bgnm', attn, ww) + bw[0][None, :, None, None]
    out = jnp.einsum('bhnm,bhmd->bhnd', attn, v)
    out = out.transpose(0, 2, 1, 3).reshape(B, N, C)
    out = out @ wp + bp[0]
    return out, attn


if __name__ == "__main__":
    B, N, C, H = 2, 8, 32, 4          # projection_dim=32, num_heads=4, dropout_rate=0.0
    key = jax.random.PRNGKey(0)
    keys = jax.random.split(key, 12)

    x = jax.random.normal(keys[0], (B, N, C), jnp.float32)
    int_matrix = 0.1 * jax.random.normal(keys[1], (B, H, N, N), jnp.float32)
    mask = (jax.random.uniform(keys[2], (B, N, N)) > 0.1).astype(jnp.float32)

    # Deterministic parameter init (synthetic; no checkpoint load).
    params = (
        0.1 * jax.random.normal(keys[3], (C, 3 * C), jnp.float32),  # W_qkv
        0.1 * jax.random.normal(keys[4], (1, 3 * C), jnp.float32),  # b_qkv
        0.3 * jax.random.normal(keys[5], (H, H), jnp.float32),      # W_l
        0.1 * jax.random.normal(keys[6], (1, H), jnp.float32),      # b_l
        0.3 * jax.random.normal(keys[7], (H, H), jnp.float32),      # W_w
        0.1 * jax.random.normal(keys[8], (1, H), jnp.float32),      # b_w
        0.1 * jax.random.normal(keys[9], (C, C), jnp.float32),      # W_proj
        0.1 * jax.random.normal(keys[10], (1, C), jnp.float32),     # b_proj
    )

    ref_out, ref_attn = tha_reference(x, params, int_matrix, mask, num_heads=H)

    # 1) Full-precision compute path: tight check against the pure-JAX reference.
    out32, attn32 = talking_head_attention(x, params, int_matrix, mask,
                                           num_heads=H, compute_dtype=jnp.float32)
    out32 = jax.block_until_ready(out32)
    attn32 = jax.block_until_ready(attn32)
    assert out32.shape == (B, N, C) and attn32.shape == (B, H, N, N)
    assert jnp.allclose(out32, ref_out, atol=2e-3, rtol=1e-2), "f32 output mismatch"
    assert jnp.allclose(attn32, ref_attn, atol=2e-3, rtol=1e-2), "f32 attn mismatch"

    # 2) bf16 MXU path (default / recommended): bf16 streams + bf16 attn output.
    out_bf, attn_bf = talking_head_attention(x, params, int_matrix, mask,
                                             num_heads=H, compute_dtype=jnp.bfloat16)
    out_bf = jax.block_until_ready(out_bf)
    attn_bf = jax.block_until_ready(attn_bf)
    assert jnp.allclose(out_bf, ref_out, atol=5e-2, rtol=5e-2), "bf16 output mismatch"
    assert jnp.allclose(attn_bf.astype(jnp.float32), ref_attn,
                        atol=5e-2, rtol=5e-2), "bf16 attn mismatch"

    # 3) Minimal-traffic path: no int_matrix / mask inputs, attn output skipped.
    ref_out0, _ = tha_reference(x, params, jnp.zeros_like(int_matrix),
                                jnp.ones_like(mask), num_heads=H)
    out_min = talking_head_attention(x, params, None, None, num_heads=H,
                                     compute_dtype=jnp.bfloat16, return_attn=False)
    out_min = jax.block_until_ready(out_min)
    assert jnp.allclose(out_min, ref_out0, atol=5e-2, rtol=5e-2), "minimal-path mismatch"

    print("KERNEL_OK")
</pallas_src>

<mosaic_0001>
module attributes {stable_mosaic.version = 11 : i64} {
  func.func @_tha_kernel(%arg0: i32, %arg1: i32, %arg2: memref<1x8x32xf32, #tpu.memory_space<vmem>>, %arg3: memref<1x4x8x8xf32, #tpu.memory_space<vmem>>, %arg4: memref<1x8x8xf32, #tpu.memory_space<vmem>>, %arg5: memref<32x32xf32, #tpu.memory_space<vmem>>, %arg6: memref<1x32xf32, #tpu.memory_space<vmem>>, %arg7: memref<32x64xf32, #tpu.memory_space<vmem>>, %arg8: memref<1x64xf32, #tpu.memory_space<vmem>>, %arg9: memref<4x4xf32, #tpu.memory_space<vmem>>, %arg10: memref<4x1xf32, #tpu.memory_space<vmem>>, %arg11: memref<4x4xf32, #tpu.memory_space<vmem>>, %arg12: memref<4x1xf32, #tpu.memory_space<vmem>>, %arg13: memref<32x32xf32, #tpu.memory_space<vmem>>, %arg14: memref<1x32xf32, #tpu.memory_space<vmem>>, %arg15: memref<1x8x32xf32, #tpu.memory_space<vmem>>, %arg16: memref<1x4x8x8xf32, #tpu.memory_space<vmem>>, %arg17: memref<2x4x8x8xf32, #tpu.memory_space<vmem>>) attributes {dimension_semantics = [#tpu.dimension_semantics<parallel>, #tpu.dimension_semantics<arbitrary>], iteration_bounds = array<i64: 2, 1>, scalar_prefetch = 0 : i64, scratch_operands = 1 : i64, tpu.core_type = #tpu.core_type<tc>, window_params = [{transform_indices = @transform_0, window_bounds = array<i64: 1, 8, 32>}, {transform_indices = @transform_1, window_bounds = array<i64: 1, 4, 8, 8>}, {transform_indices = @transform_2, window_bounds = array<i64: 1, 8, 8>}, {pipeline_mode = #tpu.pipeline_mode<synchronous>, transform_indices = @transform_3, window_bounds = array<i64: 32, 32>}, {pipeline_mode = #tpu.pipeline_mode<synchronous>, transform_indices = @transform_4, window_bounds = array<i64: 1, 32>}, {pipeline_mode = #tpu.pipeline_mode<synchronous>, transform_indices = @transform_5, window_bounds = array<i64: 32, 64>}, {pipeline_mode = #tpu.pipeline_mode<synchronous>, transform_indices = @transform_6, window_bounds = array<i64: 1, 64>}, {pipeline_mode = #tpu.pipeline_mode<synchronous>, transform_indices = @transform_7, window_bounds = array<i64: 4, 4>}, {pipeline_mode = #tpu.pipeline_mode<synchronous>, transform_indices = @transform_8, window_bounds = array<i64: 4, 1>}, {pipeline_mode = #tpu.pipeline_mode<synchronous>, transform_indices = @transform_9, window_bounds = array<i64: 4, 4>}, {pipeline_mode = #tpu.pipeline_mode<synchronous>, transform_indices = @transform_10, window_bounds = array<i64: 4, 1>}, {pipeline_mode = #tpu.pipeline_mode<synchronous>, transform_indices = @transform_11, window_bounds = array<i64: 32, 32>}, {pipeline_mode = #tpu.pipeline_mode<synchronous>, transform_indices = @transform_12, window_bounds = array<i64: 1, 32>}, {transform_indices = @transform_13, window_bounds = array<i64: 1, 8, 32>}, {transform_indices = @transform_14, window_bounds = array<i64: 1, 4, 8, 8>}]} {
    %c0_i32 = arith.constant 0 : i32
    %0 = arith.cmpi eq, %arg1, %c0_i32 : i32
    %1 = arith.extui %0 : i1 to i32
    %c0_i32_0 = arith.constant 0 : i32
    %2 = arith.cmpi ne, %1, %c0_i32_0 : i32
    scf.if %2 {
      %c0_47 = arith.constant 0 : index
      %c0_48 = arith.constant 0 : index
      %c0_49 = arith.constant 0 : index
      %67 = vector.load %arg2[%c0_47, %c0_48, %c0_49] : memref<1x8x32xf32, #tpu.memory_space<vmem>>, vector<1x8x32xf32>
      %68 = vector.shape_cast %67 : vector<1x8x32xf32> to vector<8x32xf32>
      %c0_50 = arith.constant 0 : index
      %c0_51 = arith.constant 0 : index
      %69 = vector.load %arg7[%c0_50, %c0_51] : memref<32x64xf32, #tpu.memory_space<vmem>>, vector<32x64xf32>
      %cst_52 = arith.constant dense<0.000000e+00> : vector<8x64xf32>
      %70 = tpu.matmul %68, %69, %cst_52 {dimension_numbers = #tpu.dot_dimension_numbers<[1], [0], [0], [1], [0, 0, 1, 1], [], []>} : vector<8x32xf32>, vector<32x64xf32>, vector<8x64xf32> -> vector<8x64xf32>
      %c0_53 = arith.constant 0 : index
      %c0_54 = arith.constant 0 : index
      %71 = vector.load %arg8[%c0_53, %c0_54] : memref<1x64xf32, #tpu.memory_space<vmem>>, vector<1x64xf32>
      %72 = vector.broadcast %71 : vector<1x64xf32> to vector<8x64xf32>
      %73 = arith.addf %70, %72 : vector<8x64xf32>
      %74 = vector.extract_strided_slice %73 {offsets = [0, 0], sizes = [8, 32], strides = [1, 1]} : vector<8x64xf32> to vector<8x32xf32>
      %75 = vector.shape_cast %74 : vector<8x32xf32> to vector<8x4x8xf32>
      %76 = tpu.transpose %75, [1, 0, 2] : vector<8x4x8xf32> -> vector<4x8x8xf32>
      %77 = vector.extract_strided_slice %73 {offsets = [0, 32], sizes = [8, 32], strides = [1, 1]} : vector<8x64xf32> to vector<8x32xf32>
      %78 = vector.shape_cast %77 : vector<8x32xf32> to vector<8x4x8xf32>
      %79 = tpu.transpose %78, [1, 0, 2] : vector<8x4x8xf32> -> vector<4x8x8xf32>
      %c0_55 = arith.constant 0 : index
      %c0_56 = arith.constant 0 : index
      %c0_57 = arith.constant 0 : index
      %c0_58 = arith.constant 0 : index
      %80 = vector.load %arg17[%c0_55, %c0_56, %c0_57, %c0_58] : memref<2x4x8x8xf32, #tpu.memory_space<vmem>>, vector<1x4x8x8xf32>
      %81 = vector.shape_cast %80 : vector<1x4x8x8xf32> to vector<4x8x8xf32>
      %82 = vector.shape_cast %76 : vector<4x8x8xf32> to vector<1x4x8x8xf32>
      tpu.vector_store %arg17[%c0_55, %c0_56, %c0_57, %c0_58], %82 {strides = array<i32>} : memref<2x4x8x8xf32, #tpu.memory_space<vmem>>, vector<1x4x8x8xf32>,
      %c1_59 = arith.constant 1 : index
      %c0_60 = arith.constant 0 : index
      %c0_61 = arith.constant 0 : index
      %c0_62 = arith.constant 0 : index
      %83 = vector.load %arg17[%c1_59, %c0_60, %c0_61, %c0_62] : memref<2x4x8x8xf32, #tpu.memory_space<vmem>>, vector<1x4x8x8xf32>
      %84 = vector.shape_cast %83 : vector<1x4x8x8xf32> to vector<4x8x8xf32>
      %85 = vector.shape_cast %79 : vector<4x8x8xf32> to vector<1x4x8x8xf32>
      tpu.vector_store %arg17[%c1_59, %c0_60, %c0_61, %c0_62], %85 {strides = array<i32>} : memref<2x4x8x8xf32, #tpu.memory_space<vmem>>, vector<1x4x8x8xf32>,
    } else {
    }
    %c8_i32 = arith.constant 8 : i32
    %3 = arith.muli %arg1, %c8_i32 : i32
    %4 = tpu.assume_multiple %3, 8 : i32
    %c0 = arith.constant 0 : index
    %5 = arith.index_cast %4 : i32 to index
    %c0_1 = arith.constant 0 : index
    %6 = vector.load %arg2[%c0, %5, %c0_1] : memref<1x8x32xf32, #tpu.memory_space<vmem>>, vector<1x8x32xf32>
    %7 = vector.shape_cast %6 : vector<1x8x32xf32> to vector<8x32xf32>
    %c0_2 = arith.constant 0 : index
    %c0_3 = arith.constant 0 : index
    %8 = vector.load %arg5[%c0_2, %c0_3] : memref<32x32xf32, #tpu.memory_space<vmem>>, vector<32x32xf32>
    %cst = arith.constant dense<0.000000e+00> : vector<8x32xf32>
    %9 = tpu.matmul %7, %8, %cst {dimension_numbers = #tpu.dot_dimension_numbers<[1], [0], [0], [1], [0, 0, 1, 1], [], []>} : vector<8x32xf32>, vector<32x32xf32>, vector<8x32xf32> -> vector<8x32xf32>
    %c0_4 = arith.constant 0 : index
    %c0_5 = arith.constant 0 : index
    %10 = vector.load %arg6[%c0_4, %c0_5] : memref<1x32xf32, #tpu.memory_space<vmem>>, vector<1x32xf32>
    %11 = vector.broadcast %10 : vector<1x32xf32> to vector<8x32xf32>
    %12 = arith.addf %9, %11 : vector<8x32xf32>
    %cst_6 = arith.constant 0.353553385 : f32
    %13 = vector.broadcast %cst_6 : f32 to vector<8x32xf32>
    %14 = arith.mulf %12, %13 : vector<8x32xf32>
    %15 = vector.shape_cast %14 : vector<8x32xf32> to vector<8x4x8xf32>
    %16 = tpu.transpose %15, [1, 0, 2] : vector<8x4x8xf32> -> vector<4x8x8xf32>
    %c0_7 = arith.constant 0 : index
    %c0_8 = arith.constant 0 : index
    %c0_9 = arith.constant 0 : index
    %c0_10 = arith.constant 0 : index
    %17 = vector.load %arg17[%c0_7, %c0_8, %c0_9, %c0_10] : memref<2x4x8x8xf32, #tpu.memory_space<vmem>>, vector<1x4x8x8xf32>
    %18 = vector.shape_cast %17 : vector<1x4x8x8xf32> to vector<4x8x8xf32>
    %c1 = arith.constant 1 : index
    %c0_11 = arith.constant 0 : index
    %c0_12 = arith.constant 0 : index
    %c0_13 = arith.constant 0 : index
    %19 = vector.load %arg17[%c1, %c0_11, %c0_12, %c0_13] : memref<2x4x8x8xf32, #tpu.memory_space<vmem>>, vector<1x4x8x8xf32>
    %20 = vector.shape_cast %19 : vector<1x4x8x8xf32> to vector<4x8x8xf32>
    "tpu.trace_start"() <{level = 10 : i32, message = "hqd,hkd->hqk"}> : () -> ()
    %cst_14 = arith.constant dense<0.000000e+00> : vector<4x8x8xf32>
    %21 = tpu.matmul %16, %18, %cst_14 {dimension_numbers = #tpu.dot_dimension_numbers<[2], [2], [1], [1], [0, 0, 0, 1, 1, 1], [0], [0]>} : vector<4x8x8xf32>, vector<4x8x8xf32>, vector<4x8x8xf32> -> vector<4x8x8xf32>
    "tpu.trace_stop"() : () -> ()
    %c0_15 = arith.constant 0 : index
    %c0_16 = arith.constant 0 : index
    %c0_17 = arith.constant 0 : index
    %c0_18 = arith.constant 0 : index
    %22 = vector.load %arg3[%c0_15, %c0_16, %c0_17, %c0_18] : memref<1x4x8x8xf32, #tpu.memory_space<vmem>>, vector<1x4x8x8xf32>
    %23 = vector.shape_cast %22 : vector<1x4x8x8xf32> to vector<4x8x8xf32>
    %24 = arith.addf %21, %23 : vector<4x8x8xf32>
    %c0_19 = arith.constant 0 : index
    %c0_20 = arith.constant 0 : index
    %25 = vector.load %arg9[%c0_19, %c0_20] : memref<4x4xf32, #tpu.memory_space<vmem>>, vector<4x4xf32>
    %26 = vector.shape_cast %24 : vector<4x8x8xf32> to vector<4x64xf32>
    %cst_21 = arith.constant dense<0.000000e+00> : vector<4x64xf32>
    %27 = tpu.matmul %25, %26, %cst_21 {dimension_numbers = #tpu.dot_dimension_numbers<[1], [0], [0], [1], [0, 0, 1, 1], [], []>} : vector<4x4xf32>, vector<4x64xf32>, vector<4x64xf32> -> vector<4x64xf32>
    %c0_22 = arith.constant 0 : index
    %c0_23 = arith.constant 0 : index
    %28 = vector.load %arg10[%c0_22, %c0_23] : memref<4x1xf32, #tpu.memory_space<vmem>>, vector<4x1xf32>
    %29 = vector.broadcast %28 : vector<4x1xf32> to vector<4x64xf32>
    %30 = arith.addf %27, %29 : vector<4x64xf32>
    %31 = vector.shape_cast %30 : vector<4x64xf32> to vector<4x8x8xf32>
    %c0_24 = arith.constant 0 : index
    %c0_25 = arith.constant 0 : index
    %c0_26 = arith.constant 0 : index
    %32 = vector.load %arg4[%c0_24, %c0_25, %c0_26] : memref<1x8x8xf32, #tpu.memory_space<vmem>>, vector<1x8x8xf32>
    %33 = vector.shape_cast %32 : vector<1x8x8xf32> to vector<8x8xf32>
    %34 = vector.shape_cast %33 : vector<8x8xf32> to vector<1x8x8xf32>
    %35 = vector.broadcast %34 : vector<1x8x8xf32> to vector<4x8x8xf32>
    %36 = arith.addf %31, %35 : vector<4x8x8xf32>
    %cst_27 = arith.constant dense<0xFF800000> : vector<4x8xf32>
    %37 = vector.multi_reduction <maximumf>, %36, %cst_27 [2] : vector<4x8x8xf32> to vector<4x8xf32>
    %38 = vector.shape_cast %37 : vector<4x8xf32> to vector<4x8x1xf32>
    %39 = vector.broadcast %38 : vector<4x8x1xf32> to vector<4x8x8xf32>
    %40 = arith.subf %36, %39 : vector<4x8x8xf32>
    %41 = math.exp %40 : vector<4x8x8xf32>
    %cst_28 = arith.constant dense<0.000000e+00> : vector<4x8xf32>
    %42 = vector.multi_reduction <add>, %41, %cst_28 [2] : vector<4x8x8xf32> to vector<4x8xf32>
    %43 = vector.shape_cast %42 : vector<4x8xf32> to vector<4x8x1xf32>
    %44 = vector.broadcast %43 : vector<4x8x1xf32> to vector<4x8x8xf32>
    %45 = arith.divf %41, %44 : vector<4x8x8xf32>
    %c0_29 = arith.constant 0 : index
    %c0_30 = arith.constant 0 : index
    %46 = vector.load %arg11[%c0_29, %c0_30] : memref<4x4xf32, #tpu.memory_space<vmem>>, vector<4x4xf32>
    %47 = vector.shape_cast %45 : vector<4x8x8xf32> to vector<4x64xf32>
    %cst_31 = arith.constant dense<0.000000e+00> : vector<4x64xf32>
    %48 = tpu.matmul %46, %47, %cst_31 {dimension_numbers = #tpu.dot_dimension_numbers<[1], [0], [0], [1], [0, 0, 1, 1], [], []>} : vector<4x4xf32>, vector<4x64xf32>, vector<4x64xf32> -> vector<4x64xf32>
    %c0_32 = arith.constant 0 : index
    %c0_33 = arith.constant 0 : index
    %49 = vector.load %arg12[%c0_32, %c0_33] : memref<4x1xf32, #tpu.memory_space<vmem>>, vector<4x1xf32>
    %50 = vector.broadcast %49 : vector<4x1xf32> to vector<4x64xf32>
    %51 = arith.addf %48, %50 : vector<4x64xf32>
    %52 = vector.shape_cast %51 : vector<4x64xf32> to vector<4x8x8xf32>
    %c0_34 = arith.constant 0 : index
    %c0_35 = arith.constant 0 : index
    %c0_36 = arith.constant 0 : index
    %c0_37 = arith.constant 0 : index
    %53 = vector.load %arg16[%c0_34, %c0_35, %c0_36, %c0_37] : memref<1x4x8x8xf32, #tpu.memory_space<vmem>>, vector<1x4x8x8xf32>
    %54 = vector.shape_cast %53 : vector<1x4x8x8xf32> to vector<4x8x8xf32>
    %55 = vector.shape_cast %52 : vector<4x8x8xf32> to vector<1x4x8x8xf32>
    tpu.vector_store %arg16[%c0_34, %c0_35, %c0_36, %c0_37], %55 {strides = array<i32>} : memref<1x4x8x8xf32, #tpu.memory_space<vmem>>, vector<1x4x8x8xf32>,
    "tpu.trace_start"() <{level = 10 : i32, message = "hqk,hkd->hqd"}> : () -> ()
    %cst_38 = arith.constant dense<0.000000e+00> : vector<4x8x8xf32>
    %56 = tpu.matmul %52, %20, %cst_38 {dimension_numbers = #tpu.dot_dimension_numbers<[2], [1], [1], [2], [0, 0, 0, 1, 1, 2], [0], [0]>} : vector<4x8x8xf32>, vector<4x8x8xf32>, vector<4x8x8xf32> -> vector<4x8x8xf32>
    "tpu.trace_stop"() : () -> ()
    %57 = tpu.transpose %56, [1, 0, 2] : vector<4x8x8xf32> -> vector<8x4x8xf32>
    %58 = vector.shape_cast %57 : vector<8x4x8xf32> to vector<8x32xf32>
    %c0_39 = arith.constant 0 : index
    %c0_40 = arith.constant 0 : index
    %59 = vector.load %arg13[%c0_39, %c0_40] : memref<32x32xf32, #tpu.memory_space<vmem>>, vector<32x32xf32>
    %cst_41 = arith.constant dense<0.000000e+00> : vector<8x32xf32>
    %60 = tpu.matmul %58, %59, %cst_41 {dimension_numbers = #tpu.dot_dimension_numbers<[1], [0], [0], [1], [0, 0, 1, 1], [], []>} : vector<8x32xf32>, vector<32x32xf32>, vector<8x32xf32> -> vector<8x32xf32>
    %c0_42 = arith.constant 0 : index
    %c0_43 = arith.constant 0 : index
    %61 = vector.load %arg14[%c0_42, %c0_43] : memref<1x32xf32, #tpu.memory_space<vmem>>, vector<1x32xf32>
    %62 = vector.broadcast %61 : vector<1x32xf32> to vector<8x32xf32>
    %63 = arith.addf %60, %62 : vector<8x32xf32>
    %c0_44 = arith.constant 0 : index
    %c0_45 = arith.constant 0 : index
    %c0_46 = arith.constant 0 : index
    %64 = vector.load %arg15[%c0_44, %c0_45, %c0_46] : memref<1x8x32xf32, #tpu.memory_space<vmem>>, vector<1x8x32xf32>
    %65 = vector.shape_cast %64 : vector<1x8x32xf32> to vector<8x32xf32>
    %66 = vector.shape_cast %63 : vector<8x32xf32> to vector<1x8x32xf32>
    tpu.vector_store %arg15[%c0_44, %c0_45, %c0_46], %66 {strides = array<i32>} : memref<1x8x32xf32, #tpu.memory_space<vmem>>, vector<1x8x32xf32>,
    return
  }
  func.func @transform_0(%arg0: i32, %arg1: i32) -> (i32, i32, i32) {
    %c0_i32 = arith.constant 0 : i32
    %c0_i32_0 = arith.constant 0 : i32
    %c0_i32_1 = arith.constant 0 : i32
    return %arg0, %c0_i32, %c0_i32_0 : i32, i32, i32
  }
  func.func @transform_1(%arg0: i32, %arg1: i32) -> (i32, i32, i32, i32) {
    %c0_i32 = arith.constant 0 : i32
    %c0_i32_0 = arith.constant 0 : i32
    %c0_i32_1 = arith.constant 0 : i32
    return %arg0, %c0_i32, %arg1, %c0_i32_0 : i32, i32, i32, i32
  }
  func.func @transform_2(%arg0: i32, %arg1: i32) -> (i32, i32, i32) {
    %c0_i32 = arith.constant 0 : i32
    %c0_i32_0 = arith.constant 0 : i32
    return %arg0, %arg1, %c0_i32 : i32, i32, i32
  }
  func.func @transform_3(%arg0: i32, %arg1: i32) -> (i32, i32) {
    %c0_i32 = arith.constant 0 : i32
    %c0_i32_0 = arith.constant 0 : i32
    %c0_i32_1 = arith.constant 0 : i32
    return %c0_i32, %c0_i32_0 : i32, i32
  }
  func.func @transform_4(%arg0: i32, %arg1: i32) -> (i32, i32) {
    %c0_i32 = arith.constant 0 : i32
    %c0_i32_0 = arith.constant 0 : i32
    %c0_i32_1 = arith.constant 0 : i32
    return %c0_i32, %c0_i32_0 : i32, i32
  }
  func.func @transform_5(%arg0: i32, %arg1: i32) -> (i32, i32) {
    %c0_i32 = arith.constant 0 : i32
    %c0_i32_0 = arith.constant 0 : i32
    %c0_i32_1 = arith.constant 0 : i32
    return %c0_i32, %c0_i32_0 : i32, i32
  }
  func.func @transform_6(%arg0: i32, %arg1: i32) -> (i32, i32) {
    %c0_i32 = arith.constant 0 : i32
    %c0_i32_0 = arith.constant 0 : i32
    %c0_i32_1 = arith.constant 0 : i32
    return %c0_i32, %c0_i32_0 : i32, i32
  }
  func.func @transform_7(%arg0: i32, %arg1: i32) -> (i32, i32) {
    %c0_i32 = arith.constant 0 : i32
    %c0_i32_0 = arith.constant 0 : i32
    %c0_i32_1 = arith.constant 0 : i32
    return %c0_i32, %c0_i32_0 : i32, i32
  }
  func.func @transform_8(%arg0: i32, %arg1: i32) -> (i32, i32) {
    %c0_i32 = arith.constant 0 : i32
    %c0_i32_0 = arith.constant 0 : i32
    %c0_i32_1 = arith.constant 0 : i32
    return %c0_i32, %c0_i32_0 : i32, i32
  }
  func.func @transform_9(%arg0: i32, %arg1: i32) -> (i32, i32) {
    %c0_i32 = arith.constant 0 : i32
    %c0_i32_0 = arith.constant 0 : i32
    %c0_i32_1 = arith.constant 0 : i32
    return %c0_i32, %c0_i32_0 : i32, i32
  }
  func.func @transform_10(%arg0: i32, %arg1: i32) -> (i32, i32) {
    %c0_i32 = arith.constant 0 : i32
    %c0_i32_0 = arith.constant 0 : i32
    %c0_i32_1 = arith.constant 0 : i32
    return %c0_i32, %c0_i32_0 : i32, i32
  }
  func.func @transform_11(%arg0: i32, %arg1: i32) -> (i32, i32) {
    %c0_i32 = arith.constant 0 : i32
    %c0_i32_0 = arith.constant 0 : i32
    %c0_i32_1 = arith.constant 0 : i32
    return %c0_i32, %c0_i32_0 : i32, i32
  }
  func.func @transform_12(%arg0: i32, %arg1: i32) -> (i32, i32) {
    %c0_i32 = arith.constant 0 : i32
    %c0_i32_0 = arith.constant 0 : i32
    %c0_i32_1 = arith.constant 0 : i32
    return %c0_i32, %c0_i32_0 : i32, i32
  }
  func.func @transform_13(%arg0: i32, %arg1: i32) -> (i32, i32, i32) {
    %c0_i32 = arith.constant 0 : i32
    %c0_i32_0 = arith.constant 0 : i32
    return %arg0, %arg1, %c0_i32 : i32, i32, i32
  }
  func.func @transform_14(%arg0: i32, %arg1: i32) -> (i32, i32, i32, i32) {
    %c0_i32 = arith.constant 0 : i32
    %c0_i32_0 = arith.constant 0 : i32
    %c0_i32_1 = arith.constant 0 : i32
    return %arg0, %c0_i32, %arg1, %c0_i32_0 : i32, i32, i32, i32
  }
}

</mosaic_0001>

<bundles_post_ra>
// kernel: tpu_custom_call.1
= control target key start
LH: loop header
LB: loop body
LE: loop exit
PB: predicated region body
PF: predicated region fallthrough
CT: control target
= control target key end

     0   :  { %s4988_s0 = inlined_call_operand.hbm [shape: f32[2,8,32], index: 0, kind: input, shape index: {}]   ;;  %s4989_s1 = inlined_call_operand.hbm [shape: f32[2,4,8,8], index: 1, kind: input, shape index: {}]   ;;  %s4990_s2 = inlined_call_operand.hbm [shape: f32[2,8,8], index: 2, kind: input, shape index: {}]   ;;  %s4991_s3 = inlined_call_operand.hbm [shape: f32[32,32], index: 3, kind: input, shape index: {}]   ;;  %s4992_s4 = inlined_call_operand.hbm [shape: f32[1,32], index: 4, kind: input, shape index: {}]   ;;  %s4993_s5 = inlined_call_operand.hbm [shape: f32[32,64], index: 5, kind: input, shape index: {}]   ;;  %s4994_s6 = inlined_call_operand.hbm [shape: f32[1,64], index: 6, kind: input, shape index: {}]   ;;  %s4995_s7 = inlined_call_operand.hbm [shape: f32[4,4], index: 7, kind: input, shape index: {}]   ;;  %s4996_s8 = inlined_call_operand.hbm [shape: f32[4,1], index: 8, kind: input, shape index: {}]   ;;  %s4997_s9 = inlined_call_operand.hbm [shape: f32[4,4], index: 9, kind: input, shape index: {}]   ;;  %s4998_s10 = inlined_call_operand.hbm [shape: f32[4,1], index: 10, kind: input, shape index: {}]   ;;  %s4999_s11 = inlined_call_operand.hbm [shape: f32[32,32], index: 11, kind: input, shape index: {}]   ;;  %s5000_s12 = inlined_call_operand.hbm [shape: f32[1,32], index: 12, kind: input, shape index: {}]   ;;  %s5001_s13 = inlined_call_operand.hbm [shape: f32[2,8,32], index: 13, kind: output, shape index: {0}]   ;;  %s5002_s14 = inlined_call_operand.hbm [shape: f32[2,4,8,8], index: 14, kind: output, shape index: {1}]  }
   0x1   :  { %5029 = sst [smem:[#allocation41_spill]] %s4988_s0 }
   0x2   :  { %5030 = sst [smem:[#allocation42_spill]] %s4989_s1 }
   0x3   :  { %5031 = sst [smem:[#allocation43_spill]] %s4990_s2 }
   0x4   :  { %5032 = sst [smem:[#allocation44_spill]] %s4991_s3 }
   0x5   :  { %5033 = sst [smem:[#allocation45_spill]] %s4993_s5 }
   0x6   :  { %5034 = sst [smem:[#allocation46_spill]] %s4995_s7 }
   0x7   :  { %5035 = sst [smem:[#allocation47_spill]] %s4997_s9 }
   0x8   :  { %5036 = sst [smem:[#allocation48_spill]] %s4998_s10 }
   0x9   :  { %5037 = sst [smem:[#allocation49_spill]] %s4999_s11 }
   0xa   :  { %5038 = sst [smem:[#allocation50_spill]] %s5000_s12 }
   0xb   :  { %5039 = sst [smem:[#allocation51_spill]] %s5001_s13 }
   0xc   :  { %5040 = sst [smem:[#allocation52_spill]] %s5002_s14 }
   0xd   :  { %20 = vsyncpa [#allocation4], 0 }
   0xe   :  { %22 = vsyncpa [#allocation4 + $0x1], 0 }
   0xf   :  { %23 = vsyncpa [#allocation7], 0 }
  0x10   :  { %25 = vsyncpa [#allocation7 + $0x1], 0 }
  0x11   :  { %26 = vsyncpa [#allocation10], 0 }
  0x12   :  { %27 = vsyncpa [#allocation13], 0 }
  0x13   :  { %28 = vsyncpa [#allocation16], 0 }
  0x14   :  { %29 = vsyncpa [#allocation19], 0 }
  0x15   :  { %30 = vsyncpa [#allocation22], 0 }
  0x16   :  { %31 = vsyncpa [#allocation5], 0 }
  0x17   :  { %33 = vsyncpa [#allocation5 + $0x1], 0 }
  0x18   :  { %34 = vsyncpa [#allocation26], 0 }
  0x19   :  { %36 = vsyncpa [#allocation26 + $0x1], 0  ;;  %s4155_s29 = smov 0   ;;  %s4157_s30 = smov 0  }
  0x1a   :  { %s4159_s15 = smov 0   ;;  %s4161_s16 = smov 0  }
  0x1b   :  { %s4163_s17 = smov 0   ;;  %s4165_s18 = smov 0  }
  0x1c LB: > { %5041 = sst [smem:[#allocation36_spill]] %s4028_s15  ;;  %s4186_s19 = sadd.s32 4294967295, %s4040_s18   ;;  %s4040_s18 = sphi %s4165_s18, %s42_s18   ;;  %s4036_s17 = sphi %s4163_s17, %s5098_s17   ;;  %s4032_s16 = sphi %s4161_s16, %s5097_s16   ;;  %s4028_s15 = sphi %s4159_s15, %s5093_s15   ;;  %s4024_s30 = sphi %s4157_s30, %s5096_s30   ;;  %s4020_s29 = sphi %s4155_s29, %s5095_s29  }
  0x1d   : > { %5042 = sst [smem:[#allocation37_spill]] %s4032_s16  ;;  %p3103_p0 = scmp.ge.s32.totalorder %s4040_s18, 1 }
  0x1e   : > { %p5011_p1 = scmp.eq.s32.totalorder %s4186_s19, 0  ;;  %p407_p2 = scmp.lt.s32.totalorder %s4040_s18, 3 }
  0x1f   : > { %s4042_s21 = smov [#allocation9]   ;;  %s4043_s24 = smov [#allocation12]  }
  0x20   : > { %p4191_p3 = pnand %p3103_p0, %p407_p2  ;;  %s419_s22 = sshll.u32 %s4042_s21, 4  ;;  %s4195_s22 = int_to_ptr.vmem [resolvable:$true] %s419_s22 }
  0x21   : > { %s443_s25 = sshll.u32 %s4043_s24, 4  ;;  %s4044_s26 = smov [#allocation15]   ;;  %s4206_s25 = int_to_ptr.vmem [resolvable:$true] %s443_s25 }
  0x22   : > { %s5043_s20 = scalar_select %p4191_p3, 1, 0 }
  0x23   : > { %p3363_p4 = pneg %p4191_p3  ;;  %s4208_s27 = sshll.u32 %s4044_s26, 4  ;;  %s469_s27 = int_to_ptr.vmem [resolvable:$true] %s4208_s27 }
  0x24   : > { %5044 = sst [smem:[#allocation38_spill]] %s5043_s20  ;;  %s5046_s3 = sld [smem:[#allocation44_spill]] }
  0x25   : > { %p4202_p6 = pnand %p3363_p4, %p5011_p1 }
  0x27   : > { %s5045_s23 = scalar_select %p4202_p6, 1, 0 }
  0x28   : > { %p4218_p8 = pneg %p4202_p6 }
  0x2a   : > { %s3532_s13 = scalar_lea.hbm %s5046_s3, 512 }
  0x2b   : > { %p3533_p7 = scmp.ne.s32.totalorder %s5046_s3, %s3532_s13  ;;  %p3539_p11 = scmp.lt.u32.totalorder %s3532_s13, %s5046_s3 }
  0x2c   : > { %s5047_s20 = scalar_select %p4218_p8, 1, 0 }
  0x2d   : > { %p3535_p9 = pnand %p4218_p8, %p3533_p7 }
  0x2f   : > { %p3536_p10 = pneg %p3535_p9 }
  0x31   : > { %p3541_p12 = pnand %p3539_p11, %p3536_p10 }
  0x33   : > { %3544 = shalt.err (!%p3541_p12)
}
  0x34   : > { %s3545_s14 = scalar_lea.vmem %s4195_s22, 512  ;;  %p3553_p4 = scmp.lt.s32.totalorder %s4195_s22, %s4195_s22 }
  0x35   : > { %p3546_p13 = scmp.ne.s32.totalorder %s4195_s22, %s3545_s14  ;;  %p3554_p5 = scmp.lt.s32.totalorder %s3545_s14, %s3545_s14 }
  0x37   : > { %p3548_p0 = pnand %p3546_p13, %p4218_p8  ;;  %p3555_p7 = por %p3554_p5, %p3553_p4 }
  0x39   : > { %p3549_p2 = pneg %p3548_p0 }
  0x3b   : > { %p3556_p9 = pnand %p3555_p7, %p3549_p2 }
  0x3d   : > { %3559 = shalt.err (!%p3556_p9)
}
  0x3e   : > { %s5013_s16 = smov 128   ;;  %s5015_s13 = smov 8  }
  0x3f   : > { %3366 = dma.hbm_to_vmem [thread:$0]  (!%p4202_p6), %s5046_s3, 512, %s4195_s22, [#allocation10], %s5013_s16, %s5013_s16, %s5015_s13  }
  0x40   : > { %s5048_s5 = sld [smem:[#allocation45_spill]] }
  0x46   : > { %s3560_s14 = scalar_lea.hbm %s5048_s5, 512 }
  0x47   : > { %p3561_p5 = scmp.ne.s32.totalorder %s5048_s5, %s3560_s14  ;;  %p3567_p12 = scmp.lt.u32.totalorder %s3560_s14, %s5048_s5 }
  0x49   : > { %p3563_p10 = pnand %p3561_p5, %p4218_p8 }
  0x4b   : > { %p3564_p11 = pneg %p3563_p10 }
  0x4d   : > { %p3569_p13 = pnand %p3567_p12, %p3564_p11 }
  0x4f   : > { %3572 = shalt.err (!%p3569_p13)
}
  0x50   : > { %s3573_s22 = scalar_lea.vmem %s4206_s25, 512  ;;  %p3581_p7 = scmp.lt.s32.totalorder %s4206_s25, %s4206_s25 }
  0x51   : > { %p3574_p0 = scmp.ne.s32.totalorder %s4206_s25, %s3573_s22  ;;  %p3582_p9 = scmp.lt.s32.totalorder %s3573_s22, %s3573_s22 }
  0x53   : > { %p3576_p2 = pnand %p3574_p0, %p4218_p8  ;;  %p3583_p5 = por %p3582_p9, %p3581_p7 }
  0x55   : > { %p3577_p4 = pneg %p3576_p2 }
  0x57   : > { %p3584_p10 = pnand %p3583_p5, %p3577_p4 }
  0x59   : > { %3587 = shalt.err (!%p3584_p10)
}
  0x5a   : > { %3372 = dma.hbm_to_vmem [thread:$0]  (!%p4202_p6), %s5048_s5, 512, %s4206_s25, [#allocation13], %s5013_s16, %s5013_s16, %s5015_s13  }
  0x5b   : > { %s5049_s7 = sld [smem:[#allocation46_spill]] }
  0x61   : > { %s3588_s28 = scalar_lea.hbm %s5049_s7, 64 }
  0x62   : > { %p3589_p11 = scmp.ne.s32.totalorder %s5049_s7, %s3588_s28  ;;  %p3595_p0 = scmp.lt.u32.totalorder %s3588_s28, %s5049_s7 }
  0x64   : > { %p3591_p12 = pnand %p3589_p11, %p4218_p8 }
  0x66   : > { %p3592_p13 = pneg %p3591_p12 }
  0x68   : > { %p3597_p2 = pnand %p3595_p0, %p3592_p13 }
  0x6a   : > { %3600 = shalt.err (!%p3597_p2)
}
  0x6b   : > { %s3601_s22 = scalar_lea.vmem %s469_s27, 64  ;;  %p3609_p5 = scmp.lt.s32.totalorder %s469_s27, %s469_s27 }
  0x6c   : > { %p3602_p4 = scmp.ne.s32.totalorder %s469_s27, %s3601_s22  ;;  %p3610_p10 = scmp.lt.s32.totalorder %s3601_s22, %s3601_s22 }
  0x6e   : > { %p3604_p7 = pnand %p3602_p4, %p4218_p8  ;;  %p3611_p1 = por %p3610_p10, %p3609_p5 }
  0x70   : > { %p3605_p9 = pneg %p3604_p7 }
  0x72   : > { %p3612_p3 = pnand %p3611_p1, %p3605_p9 }
  0x74   : > { %3615 = shalt.err (!%p3612_p3)
}
  0x75   : > { %3378 = dma.hbm_to_vmem [thread:$0]  (!%p4202_p6), %s5049_s7, 64, %s469_s27, [#allocation16]  }
  0x76   : > { %s4047_s2 = smov [#allocation18]   ;;  %s4048_s12 = smov [#allocation21]  }
  0x77   : > { %s490_s10 = sshll.u32 %s4047_s2, 4  ;;  %s511_s28 = sshll.u32 %s4048_s12, 4  ;;  %s491_s10 = int_to_ptr.vmem [resolvable:$true] %s490_s10  ;;  %s512_s28 = int_to_ptr.vmem [resolvable:$true] %s511_s28 }
  0x78   : > { %s5050_s9 = sld [smem:[#allocation47_spill]] }
  0x7e   : > { %s3616_s26 = scalar_lea.hbm %s5050_s9, 64 }
  0x7f   : > { %p3617_p1 = scmp.ne.s32.totalorder %s5050_s9, %s3616_s26  ;;  %p3623_p12 = scmp.lt.u32.totalorder %s3616_s26, %s5050_s9 }
  0x81   : > { %p3619_p3 = pnand %p3617_p1, %p4218_p8 }
  0x83   : > { %p3620_p11 = pneg %p3619_p3 }
  0x85   : > { %p3625_p13 = pnand %p3623_p12, %p3620_p11 }
  0x87   : > { %3628 = shalt.err (!%p3625_p13)
}
  0x88   : > { %s3629_s27 = scalar_lea.vmem %s491_s10, 64  ;;  %p3637_p7 = scmp.lt.s32.totalorder %s491_s10, %s491_s10 }
  0x89   : > { %p3630_p0 = scmp.ne.s32.totalorder %s491_s10, %s3629_s27  ;;  %p3638_p9 = scmp.lt.s32.totalorder %s3629_s27, %s3629_s27 }
  0x8b   : > { %p3632_p2 = pnand %p3630_p0, %p4218_p8  ;;  %p3639_p5 = por %p3638_p9, %p3637_p7 }
  0x8d   : > { %p3633_p4 = pneg %p3632_p2 }
  0x8f   : > { %p3640_p10 = pnand %p3639_p5, %p3633_p4 }
  0x91   : > { %3643 = shalt.err (!%p3640_p10)
}
  0x92   : > { %3384 = dma.hbm_to_vmem [thread:$0]  (!%p4202_p6), %s5050_s9, 64, %s491_s10, [#allocation19]  }
  0x93   : > { %s5051_s11 = sld [smem:[#allocation49_spill]] }
  0x99   : > { %s3644_s21 = scalar_lea.hbm %s5051_s11, 512 }
  0x9a   : > { %p3645_p1 = scmp.ne.s32.totalorder %s5051_s11, %s3644_s21  ;;  %p3651_p12 = scmp.lt.u32.totalorder %s3644_s21, %s5051_s11 }
  0x9c   : > { %p3647_p3 = pnand %p3645_p1, %p4218_p8 }
  0x9e   : > { %p3648_p11 = pneg %p3647_p3 }
  0xa0   : > { %p3653_p13 = pnand %p3651_p12, %p3648_p11 }
  0xa2   : > { %3656 = shalt.err (!%p3653_p13)
}
  0xa3   : > { %s3657_s25 = scalar_lea.vmem %s512_s28, 512  ;;  %p3665_p7 = scmp.lt.s32.totalorder %s512_s28, %s512_s28 }
  0xa4   : > { %p3658_p0 = scmp.ne.s32.totalorder %s512_s28, %s3657_s25  ;;  %p3666_p9 = scmp.lt.s32.totalorder %s3657_s25, %s3657_s25 }
  0xa6   : > { %p3660_p2 = pnand %p3658_p0, %p4218_p8  ;;  %p3667_p5 = por %p3666_p9, %p3665_p7 }
  0xa8   : > { %p3661_p4 = pneg %p3660_p2 }
  0xaa   : > { %p3668_p10 = pnand %p3667_p5, %p3661_p4 }
  0xac   : > { %3671 = shalt.err (!%p3668_p10)
}
  0xad   : > { %s5052_s10 = smov 128   ;;  %s3102_s2 = sadd.s32 4294967294, %s4040_s18  }
  0xae   : > { %3390 = dma.hbm_to_vmem [thread:$0]  (!%p4202_p6), %s5051_s11, 512, %s512_s28, [#allocation22], %s5052_s10, %s5052_s10, %s5015_s13  }
  0xaf   : > { %s54_s16 = sadd.s32 1, %s4036_s17  ;;  %s61_s12 = sadd.s32 1, %s4028_s15 }
  0xb0   : > { %p56_p1 = scmp.ge.s32.totalorder %s54_s16, 2  ;;  %p68_p3 = scmp.ne.s32.totalorder %s4028_s15, %s4024_s30 }
  0xb1   : > { %p69_p11 = scmp.eq.s32.totalorder %s4040_s18, 0  ;;  %p74_p12 = scmp.ne.s32.totalorder %s4024_s30, %s4020_s29 }
  0xb2   : > { %s5100_s16 = smov (%p56_p1, %s54_s16), 0  ;;  %p5054_p0 = scmp.eq.s32.totalorder %s4186_s19, 0 }
  0xb3   : > { %5053 = sst [smem:[#allocation39_spill]] %s5100_s16  ;;  %p70_p13 = por %p69_p11, %p68_p3 }
  0xb4   : > { %p4338_p2 = por %p5054_p0, %p74_p12  ;;  %s58_s28 = ssub.s32 %s4036_s17, %s5100_s16 }
  0xb5   : > { %p366_p4 = scmp.eq.s32.totalorder %s4186_s19, 1  ;;  %p59_p7 = scmp.eq.s32.totalorder %s58_s28, 0 }
  0xb6   : > { %s5055_s21 = scalar_select %p4338_p2, 1, 0 }
  0xb7   : > { %p372_p9 = scmp.eq.s32.totalorder %s3102_s2, 1  ;;  %p4345_p5 = por %p366_p4, %p68_p3 }
  0xb8   : > { %p3421_p10 = scmp.lt.s32.totalorder %s4040_s18, 2  ;;  %s4358_s22 = sand.u32 1, %s4028_s15  }
  0xb9   : > { %s5056_s24 = scalar_select %p4345_p5, 1, 0 }
  0xba   : > { %s4351_s26 = scalar_select %p59_p7, %s4028_s15, %s61_s12  }
  0xbb   : > { %p4353_p1 = por %p372_p9, %p74_p12  ;;  %p4360_p11 = pnand %p3421_p10, %p70_p13 }
  0xbc   : > { %5057 = sst [smem:[#allocation40_spill]] %s4351_s26  ;;  %s554_s27 = sand.u32 1, %s4040_s18  }
  0xbd   : > { %s5058_s14 = scalar_select %p4353_p1, 1, 0 }
  0xbe   : > { %s5059_s25 = scalar_select %p4360_p11, 1, 0 }
  0xbf   : > { %s3117_s0 = sshll.u32 %s4358_s22, 5  ;;  %s3175_s2 = sshll.u32 %s4036_s17, 9 }
  0xc0   : > { %s558_s28 = scalar_lea.vmem [#allocation6], %s3117_s0  ;;  %s5060_s1 = sld [smem:[#allocation42_spill]] }
  0xc1   : > { %s566_s13 = sshll.u32 %s558_s28, 4  ;;  %s4374_s7 = scalar_lea.sflag [#allocation7], %s554_s27  ;;  %s4372_s13 = int_to_ptr.vmem [resolvable:$true] %s566_s13 }
  0xc2   : > { %p4380_p12 = pneg %p4360_p11 }
  0xc4   : > { %s5061_s11 = scalar_select %p4380_p12, 1, 0 }
  0xc6   : > { %s4370_s5 = scalar_lea.hbm %s5060_s1, %s3175_s2  ;;  %s3677_s2 = scalar_lea.hbm %s5060_s1, 1024 }
  0xc7   : > { %s3672_s9 = scalar_lea.hbm %s4370_s5, 512  ;;  %p3678_p4 = scmp.lt.u32.totalorder %s4370_s5, %s5060_s1 }
  0xc8   : > { %p3673_p3 = scmp.ne.s32.totalorder %s4370_s5, %s3672_s9  ;;  %p3679_p7 = scmp.lt.u32.totalorder %s3677_s2, %s3672_s9 }
  0xc9   : > { %p3681_p10 = scmp.lt.u32.totalorder %s3672_s9, %s4370_s5 }
  0xca   : > { %p3675_p13 = pnand %p4380_p12, %p3673_p3  ;;  %p3680_p9 = por %p3679_p7, %p3678_p4 }
  0xcc   : > { %p3676_p0 = pneg %p3675_p13  ;;  %p3682_p1 = por %p3681_p10, %p3680_p9 }
  0xce   : > { %p3683_p5 = pnand %p3682_p1, %p3676_p0 }
  0xd0   : > { %3686 = shalt.err (!%p3683_p5)
}
  0xd1   : > { %s3687_s27 = scalar_lea.vmem %s4372_s13, 512  ;;  %s4049_s3 = smov [#allocation6]  }
  0xd2   : > { %p3688_p3 = scmp.ne.s32.totalorder %s4372_s13, %s3687_s27  ;;  %s3692_s0 = sshll.u32 %s4049_s3, 4  ;;  %s3693_s0 = int_to_ptr.vmem [resolvable:$false] %s3692_s0 }
  0xd3   : > { %s3694_s28 = scalar_lea.vmem %s3693_s0, 1024  ;;  %p3695_p6 = scmp.lt.s32.totalorder %s4372_s13, %s3693_s0 }
  0xd4   : > { %p3690_p13 = pnand %p3688_p3, %p4380_p12  ;;  %p3696_p8 = scmp.lt.s32.totalorder %s3694_s28, %s3687_s27 }
  0xd6   : > { %p3691_p2 = pneg %p3690_p13  ;;  %p3697_p4 = por %p3696_p8, %p3695_p6 }
  0xd8   : > { %p3698_p7 = pnand %p3697_p4, %p3691_p2 }
  0xda   : > { %3701 = shalt.err (!%p3698_p7)
}
  0xdb   : > { %s5062_s9 = smov 8   ;;  %s4050_s2 = smov [#allocation11]  }
  0xdc   : > { %3400 = dma.hbm_to_vmem [thread:$0]  (!%p4360_p11), %s4370_s5, 512, %s4372_s13, %s4374_s7, %s5052_s10, %s5052_s10, %s5062_s9  }
  0xdd   : > { %s433_s12 = sshll.u32 %s4050_s2, 4  ;;  %s4051_s3 = smov [#allocation14]   ;;  %s434_s12 = int_to_ptr.vmem [resolvable:$true] %s433_s12 }
  0xde   : > { %s457_s1 = sshll.u32 %s4051_s3, 4  ;;  %s3702_s28 = scalar_lea.hbm %s4992_s4, 16  ;;  %s4407_s1 = int_to_ptr.vmem [resolvable:$true] %s457_s1 }
  0xdf   : > { %p3703_p6 = scmp.ne.s32.totalorder %s4992_s4, %s3702_s28  ;;  %p5063_p8 = scmp.ne.s32.totalorder %s5047_s20, 0 }
  0xe0   : > { %p3709_p1 = scmp.lt.u32.totalorder %s3702_s28, %s4992_s4 }
  0xe1   : > { %p3705_p2 = pnand %p3703_p6, %p5063_p8 }
  0xe3   : > { %p3706_p5 = pneg %p3705_p2 }
  0xe5   : > { %p3711_p0 = pnand %p3709_p1, %p3706_p5 }
  0xe7   : > { %3714 = shalt.err (!%p3711_p0)
}
  0xe8   : > { %s3715_s13 = scalar_lea.vmem %s434_s12, 16  ;;  %s3722_s10 = scalar_lea.vmem %s434_s12, 32 }
  0xe9   : > { %p3716_p9 = scmp.ne.s32.totalorder %s434_s12, %s3715_s13  ;;  %p3723_p13 = scmp.lt.s32.totalorder %s434_s12, %s434_s12 }
  0xea   : > { %p3724_p4 = scmp.lt.s32.totalorder %s3722_s10, %s3715_s13 }
  0xeb   : > { %p3718_p10 = pnand %p3716_p9, %p5063_p8 }
  0xec   : > { %p3725_p7 = por %p3724_p4, %p3723_p13 }
  0xed   : > { %p3719_p3 = pneg %p3718_p10 }
  0xef   : > { %p3726_p11 = pnand %p3725_p7, %p3719_p3 }
  0xf1   : > { %3729 = shalt.err (!%p3726_p11)
}
  0xf2   : > { %p5064_p6 = scmp.ne.s32.totalorder %s5045_s23, 0  ;;  %s3730_s2 = scalar_lea.hbm %s4994_s6, 16 }
  0xf3   : > { %p3731_p2 = scmp.ne.s32.totalorder %s4994_s6, %s3730_s2  ;;  %p3737_p11 = scmp.lt.u32.totalorder %s3730_s2, %s4994_s6 }
  0xf4   : > { %3369 = dma.hbm_to_vmem [thread:$0]  (!%p5064_p6), %s4992_s4, 16, %s434_s12, [#allocation10]  }
  0xf5   : > { %p3733_p5 = pnand %p3731_p2, %p5063_p8 }
  0xf7   : > { %p3734_p1 = pneg %p3733_p5 }
  0xf9   : > { %p3739_p0 = pnand %p3737_p11, %p3734_p1 }
  0xfb   : > { %3742 = shalt.err (!%p3739_p0)
}
  0xfc   : > { %s3743_s12 = scalar_lea.vmem %s4407_s1, 16  ;;  %s3750_s5 = scalar_lea.vmem %s4407_s1, 32 }
  0xfd   : > { %p3744_p9 = scmp.ne.s32.totalorder %s4407_s1, %s3743_s12  ;;  %p3751_p13 = scmp.lt.s32.totalorder %s4407_s1, %s4407_s1 }
  0xfe   : > { %p3752_p4 = scmp.lt.s32.totalorder %s3750_s5, %s3743_s12 }
  0xff   : > { %p3746_p10 = pnand %p3744_p9, %p5063_p8 }
 0x100   : > { %p3753_p7 = por %p3752_p4, %p3751_p13 }
 0x101   : > { %p3747_p3 = pneg %p3746_p10 }
 0x103   : > { %p3754_p2 = pnand %p3753_p7, %p3747_p3 }
 0x105   : > { %3757 = shalt.err (!%p3754_p2)
}
 0x106   : > { %3375 = dma.hbm_to_vmem [thread:$0]  (!%p5064_p6), %s4994_s6, 16, %s4407_s1, [#allocation13]  }
 0x107   : > { %s4052_s16 = smov [#allocation17]   ;;  %s4053_s15 = smov [#allocation20]  }
 0x108   : > { %s479_s26 = sshll.u32 %s4052_s16, 4  ;;  %s501_s9 = sshll.u32 %s4053_s15, 4  ;;  %s480_s26 = int_to_ptr.vmem [resolvable:$true] %s479_s26  ;;  %s4451_s9 = int_to_ptr.vmem [resolvable:$true] %s501_s9 }
 0x109   : > { %s3758_s27 = scalar_lea.hbm %s4996_s8, 64 }
 0x10a   : > { %p3759_p5 = scmp.ne.s32.totalorder %s4996_s8, %s3758_s27  ;;  %p3765_p0 = scmp.lt.u32.totalorder %s3758_s27, %s4996_s8 }
 0x10c   : > { %p3761_p1 = pnand %p3759_p5, %p5063_p8 }
 0x10e   : > { %p3762_p11 = pneg %p3761_p1 }
 0x110   : > { %p3767_p9 = pnand %p3765_p0, %p3762_p11 }
 0x112   : > { %3770 = shalt.err (!%p3767_p9)
}
 0x113   : > { %s3771_s5 = scalar_lea.vmem %s480_s26, 64  ;;  %p3779_p4 = scmp.lt.s32.totalorder %s480_s26, %s480_s26 }
 0x114   : > { %p3772_p10 = scmp.ne.s32.totalorder %s480_s26, %s3771_s5  ;;  %p3780_p7 = scmp.lt.s32.totalorder %s3771_s5, %s3771_s5 }
 0x116   : > { %p3774_p3 = pnand %p3772_p10, %p5063_p8  ;;  %p3781_p2 = por %p3780_p7, %p3779_p4 }
 0x118   : > { %p3775_p13 = pneg %p3774_p3 }
 0x11a   : > { %p3782_p12 = pnand %p3781_p2, %p3775_p13 }
 0x11c   : > { %3785 = shalt.err (!%p3782_p12)
}
 0x11d   : > { %3381 = dma.hbm_to_vmem [thread:$0]  (!%p5064_p6), %s4996_s8, 64, %s480_s26, [#allocation16]  }
 0x11e   : > { %s5065_s2 = sld [smem:[#allocation48_spill]] }
 0x124   : > { %s3786_s3 = scalar_lea.hbm %s5065_s2, 64 }
 0x125   : > { %p3787_p5 = scmp.ne.s32.totalorder %s5065_s2, %s3786_s3  ;;  %p3793_p12 = scmp.lt.u32.totalorder %s3786_s3, %s5065_s2 }
 0x127   : > { %p3789_p1 = pnand %p3787_p5, %p5063_p8 }
 0x129   : > { %p3790_p11 = pneg %p3789_p1 }
 0x12b   : > { %p3795_p0 = pnand %p3793_p12, %p3790_p11 }
 0x12d   : > { %3798 = shalt.err (!%p3795_p0)
}
 0x12e   : > { %s3799_s26 = scalar_lea.vmem %s4451_s9, 64  ;;  %p3807_p13 = scmp.lt.s32.totalorder %s4451_s9, %s4451_s9 }
 0x12f   : > { %p3800_p9 = scmp.ne.s32.totalorder %s4451_s9, %s3799_s26  ;;  %p3808_p4 = scmp.lt.s32.totalorder %s3799_s26, %s3799_s26 }
 0x131   : > { %p3802_p10 = pnand %p3800_p9, %p5063_p8  ;;  %p3809_p7 = por %p3808_p4, %p3807_p13 }
 0x133   : > { %p3803_p3 = pneg %p3802_p10 }
 0x135   : > { %p3810_p2 = pnand %p3809_p7, %p3803_p3 }
 0x137   : > { %3813 = shalt.err (!%p3810_p2)
}
 0x138   : > { %3387 = dma.hbm_to_vmem [thread:$0]  (!%p5064_p6), %s5065_s2, 64, %s4451_s9, [#allocation19]  }
 0x139   : > { %s4054_s13 = smov [#allocation23]   ;;  %s5028_s16 = sshll.u32 %s4358_s22, 3 }
 0x13a   : > { %s525_s10 = sshll.u32 %s4054_s13, 4  ;;  %s5066_s27 = sld [smem:[#allocation50_spill]]  ;;  %s526_s10 = int_to_ptr.vmem [resolvable:$true] %s525_s10 }
 0x140   : > { %s3814_s0 = scalar_lea.hbm %s5066_s27, 16 }
 0x141   : > { %p3815_p5 = scmp.ne.s32.totalorder %s5066_s27, %s3814_s0  ;;  %p3821_p12 = scmp.lt.u32.totalorder %s3814_s0, %s5066_s27 }
 0x143   : > { %p3817_p1 = pnand %p3815_p5, %p5063_p8 }
 0x145   : > { %p3818_p11 = pneg %p3817_p1 }
 0x147   : > { %p3823_p0 = pnand %p3821_p12, %p3818_p11 }
 0x149   : > { %3826 = shalt.err (!%p3823_p0)
}
 0x14a   : > { %s3827_s9 = scalar_lea.vmem %s526_s10, 16  ;;  %s3834_s5 = scalar_lea.vmem %s526_s10, 32 }
 0x14b   : > { %p3828_p9 = scmp.ne.s32.totalorder %s526_s10, %s3827_s9  ;;  %p3835_p13 = scmp.lt.s32.totalorder %s526_s10, %s526_s10 }
 0x14c   : > { %p3836_p4 = scmp.lt.s32.totalorder %s3834_s5, %s3827_s9 }
 0x14d   : > { %p3830_p10 = pnand %p3828_p9, %p5063_p8 }
 0x14e   : > { %p3837_p7 = por %p3836_p4, %p3835_p13 }
 0x14f   : > { %p3831_p3 = pneg %p3830_p10 }
 0x151   : > { %p3838_p2 = pnand %p3837_p7, %p3831_p3 }
 0x153   : > { %3841 = shalt.err (!%p3838_p2)
}
 0x154   : > { %3393 = dma.hbm_to_vmem [thread:$0]  (!%p5064_p6), %s5066_s27, 16, %s526_s10, [#allocation22]  }
 0x155   : > { %s3116_s20 = sshll.u32 %s4036_s17, 7  ;;  %s540_s3 = scalar_lea.vmem [#allocation3], %s5028_s16 }
 0x156   : > { %s547_s0 = sshll.u32 %s540_s3, 4  ;;  %s5067_s26 = sld [smem:[#allocation41_spill]]  ;;  %s548_s0 = int_to_ptr.vmem [resolvable:$true] %s547_s0 }
 0x157   : > { %s537_s23 = scalar_lea.sflag [#allocation4], %s4358_s22  ;;  %p5068_p5 = scmp.ne.s32.totalorder %s5061_s11, 0 }
 0x15c   : > { %s4521_s1 = scalar_lea.hbm %s5067_s26, %s3116_s20  ;;  %s3847_s13 = scalar_lea.hbm %s5067_s26, 256 }
 0x15d   : > { %s3842_s9 = scalar_lea.hbm %s4521_s1, 128  ;;  %p3848_p11 = scmp.lt.u32.totalorder %s4521_s1, %s5067_s26 }
 0x15e   : > { %p3843_p8 = scmp.ne.s32.totalorder %s4521_s1, %s3842_s9  ;;  %p3849_p12 = scmp.lt.u32.totalorder %s3847_s13, %s3842_s9 }
 0x15f   : > { %p3851_p9 = scmp.lt.u32.totalorder %s3842_s9, %s4521_s1 }
 0x160   : > { %p3845_p6 = pnand %p3843_p8, %p5068_p5  ;;  %p3850_p0 = por %p3849_p12, %p3848_p11 }
 0x162   : > { %p3846_p1 = pneg %p3845_p6  ;;  %p3852_p10 = por %p3851_p9, %p3850_p0 }
 0x164   : > { %p3853_p3 = pnand %p3852_p10, %p3846_p1 }
 0x166   : > { %3856 = shalt.err (!%p3853_p3)
}
 0x167   : > { %s3857_s28 = scalar_lea.vmem %s548_s0, 128  ;;  %s4055_s12 = smov [#allocation3]  }
 0x168   : > { %p3858_p13 = scmp.ne.s32.totalorder %s548_s0, %s3857_s28  ;;  %s3862_s16 = sshll.u32 %s4055_s12, 4  ;;  %s3863_s16 = int_to_ptr.vmem [resolvable:$false] %s3862_s16 }
 0x169   : > { %s3864_s10 = scalar_lea.vmem %s3863_s16, 256  ;;  %p3865_p2 = scmp.lt.s32.totalorder %s548_s0, %s3863_s16 }
 0x16a   : > { %p3860_p4 = pnand %p3858_p13, %p5068_p5  ;;  %p3866_p8 = scmp.lt.s32.totalorder %s3864_s10, %s3857_s28 }
 0x16c   : > { %p3861_p7 = pneg %p3860_p4  ;;  %p3867_p6 = por %p3866_p8, %p3865_p2 }
 0x16e   : > { %p3868_p11 = pnand %p3867_p6, %p3861_p7 }
 0x170   : > { %3871 = shalt.err (!%p3868_p11)
}
 0x171   : > { %p5069_p12 = scmp.ne.s32.totalorder %s5059_s25, 0  ;;  %s5070_s13 = sld [smem:[#allocation43_spill]] }
 0x172   : > { %s5071_s3 = sshll.u32 %s4358_s22, 3 }
 0x173   : > { %3397 = dma.hbm_to_vmem [thread:$0]  (!%p5069_p12), %s4521_s1, 128, %s548_s0, %s537_s23  }
 0x174   : > { %s580_s16 = scalar_lea.vmem [#allocation8], %s5071_s3 }
 0x175   : > { %s588_s28 = sshll.u32 %s580_s16, 4  ;;  %s589_s28 = int_to_ptr.vmem [resolvable:$true] %s588_s28 }
 0x177   : > { %s4546_s15 = scalar_lea.hbm %s5070_s13, %s3116_s20  ;;  %s3877_s23 = scalar_lea.hbm %s5070_s13, 256 }
 0x178   : > { %s3872_s12 = scalar_lea.hbm %s4546_s15, 128  ;;  %p3878_p10 = scmp.lt.u32.totalorder %s4546_s15, %s5070_s13 }
 0x179   : > { %p3873_p1 = scmp.ne.s32.totalorder %s4546_s15, %s3872_s12  ;;  %p3879_p3 = scmp.lt.u32.totalorder %s3877_s23, %s3872_s12 }
 0x17a   : > { %p3881_p4 = scmp.lt.u32.totalorder %s3872_s12, %s4546_s15 }
 0x17b   : > { %p3875_p0 = pnand %p3873_p1, %p5068_p5  ;;  %p3880_p13 = por %p3879_p3, %p3878_p10 }
 0x17d   : > { %p3876_p9 = pneg %p3875_p0  ;;  %p3882_p7 = por %p3881_p4, %p3880_p13 }
 0x17f   : > { %p3883_p2 = pnand %p3882_p7, %p3876_p9 }
 0x181   : > { %3886 = shalt.err (!%p3883_p2)
}
 0x182   : > { %s3887_s22 = scalar_lea.vmem %s589_s28, 128  ;;  %s4056_s9 = smov [#allocation8]  }
 0x183   : > { %p3888_p8 = scmp.ne.s32.totalorder %s589_s28, %s3887_s22  ;;  %s3892_s5 = sshll.u32 %s4056_s9, 4  ;;  %s3893_s5 = int_to_ptr.vmem [resolvable:$false] %s3892_s5 }
 0x184   : > { %s3894_s3 = scalar_lea.vmem %s3893_s5, 256  ;;  %p3895_p1 = scmp.lt.s32.totalorder %s589_s28, %s3893_s5 }
 0x185   : > { %p3890_p6 = pnand %p3888_p8, %p5068_p5  ;;  %p3896_p0 = scmp.lt.s32.totalorder %s3894_s3, %s3887_s22 }
 0x187   : > { %p3891_p11 = pneg %p3890_p6  ;;  %p3897_p12 = por %p3896_p0, %p3895_p1 }
 0x189   : > { %p3898_p3 = pnand %p3897_p12, %p3891_p11 }
 0x18b   : > { %3901 = shalt.err (!%p3898_p3)
}
 0x18c   : > { %p5072_p10 = scmp.ne.s32.totalorder %s5059_s25, 0  ;;  %s5073_s16 = sld [smem:[#allocation38_spill]] }
 0x18e   : > { %3403 = dma.hbm_to_vmem [thread:$0]  (!%p5072_p10), %s4546_s15, 128, %s589_s28, %s4374_s7  }
 0x192   : > { %p5074_p9 = scmp.ne.s32.totalorder %s5073_s16, 0 }
 0x193   : > { %s4571_s11 = sand.u32 (!%p5074_p9), 1, %s4024_s30   ;;  %p5075_p5 = scmp.ne.s32.totalorder (!%p5074_p9), %s5055_s21, 0 }
 0x194   : > { %597 = sbr.rel (%p5074_p9) target bundleno = 2906 (0xb5a), region = 72  ;;  %s4574_s12 = sshll.u32 (!%p5074_p9), %s4571_s11, 3 }
 0x195   : > { %s600_s0 = scalar_lea.sflag (!%p5074_p9), [#allocation4], %s4571_s11  ;;  %s603_s1 = scalar_lea.vmem (!%p5074_p9), [#allocation3], %s4574_s12 }
 0x19b   : > { %3983 = dma.done.wait (%p5075_p5), %s600_s0, 128  }
 0x19c   : > { %3985 = vsyncadd (%p5075_p5), %s600_s0, 4294967168  ;;  %s608_s7 = sand.u32 1, %s4186_s19   ;;  %s3124_s25 = sshll.u32 %s4571_s11, 5 }
 0x19d   : > { %s609_s15 = scalar_lea.sflag [#allocation7], %s608_s7  ;;  %s4586_s28 = scalar_lea.vmem [#allocation6], %s3124_s25 }
 0x19e   : > { %3987 = dma.done.wait (%p5075_p5), %s609_s15, 640  }
 0x19f   : > { %3989 = vsyncadd (%p5075_p5), %s609_s15, 4294966656  ;;  %s621_s23 = scalar_lea.vmem [#allocation8], %s4574_s12  ;;  %p5076_p12 = scmp.eq.s32.totalorder %s4186_s19, 0 }
 0x1a1   : > { %3991 = dma.done.wait (%p5076_p12), [#allocation10], 528   ;;  %p5077_p13 = pmov %p5076_p12 }
 0x1a2   : > { %p5078_p4 = pmov %p5076_p12 }
 0x1a3   : > { %3993 = vsyncadd (%p5077_p13), [#allocation10], 4294966768 }
 0x1a4   : > { %3995 = dma.done.wait (%p5078_p4), [#allocation13], 528   ;;  %p5079_p7 = pmov %p5078_p4 }
 0x1a5   : > { %p5080_p2 = pmov %p5078_p4 }
 0x1a6   : > { %3997 = vsyncadd (%p5079_p7), [#allocation13], 4294966768 }
 0x1a7   : > { %3999 = dma.done.wait (%p5080_p2), [#allocation16], 128   ;;  %p5081_p8 = pmov %p5080_p2 }
 0x1a8   : > { %p5082_p6 = pmov %p5080_p2 }
 0x1a9   : > { %4001 = vsyncadd (%p5081_p8), [#allocation16], 4294967168 }
 0x1aa   : > { %4003 = dma.done.wait (%p5082_p6), [#allocation19], 128   ;;  %p5083_p11 = pmov %p5080_p2 }
 0x1ab   : > { %p5084_p1 = pmov %p5080_p2 }
 0x1ac   : > { %4005 = vsyncadd (%p5083_p11), [#allocation19], 4294967168 }
 0x1ad   : > { %4007 = dma.done.wait (%p5084_p1), [#allocation22], 528   ;;  %p5085_p0 = pmov %p5084_p1 }
 0x1ae   : > { %v4057_v0 = vmov 0.0|0.0   ;;  %vm4058_vm0 = vmmov 0   ;;  %v4059_v1 = vmov 0.0   ;;  %v726_v2 = vld [vmem:[#allocation12] sm:$0xff]  ;;  %v727_v3 = vld [vmem:[#allocation12 + $0x8] sm:$0xff]  ;;  %v728_v7 = vld [vmem:[#allocation12 + $0x10] sm:$0xff]  ;;  %v826_v26 = vlaneseq }
 0x1af   : > { %4009 = vsyncadd (%p5085_p0), [#allocation22], 4294966768  ;;  %3295 = vmatprep.subr.bf16.mxu0 %v4057_v0  ;;  %3301 = vmatprep.subr.bf16.mxu1 %v4057_v0  ;;  %v1118_v4 = vld [vmem:[#allocation9] sm:$0xff]  ;;  %v3296_v5 = vpack.c.bf16 %v727_v3, %v726_v2  ;;  %v1119_v6 = vld [vmem:[#allocation9 + $0x8] sm:$0xff]  ;;  %vm737_vm1 = vcmask 261120   ;;  %s4060_s19 = smov 104  }
 0x1b0   : > { %3220 = vmatprep.mubr.msk.f32.mxu0 %vm4058_vm0, %v4059_v1  ;;  %3231 = vmatprep.mubr.msk.f32.mxu1 %vm4058_vm0, %v4059_v1  ;;  %v729_v8 = vld [vmem:[#allocation12 + $0x18] sm:$0xff]  ;;  %v3302_v9 = vpack.c.bf16 %v1119_v6, %v1118_v4  ;;  %v1120_v10 = vld [vmem:[#allocation9 + $0x10] sm:$0xff]  ;;  %v3138_v15 = vld [vmem:[#allocation14] ss:$0 sm:$0xff]  ;;  %s4061_s21 = smov 120   ;;  %s4062_s10 = smov 112  }
 0x1b1   : > { %v1121_v11 = vld [vmem:[#allocation9 + $0x18] sm:$0xff]  ;;  %3297 = vmatpush3.bf16.msra.mxu0 %v3296_v5  ;;  %v3299_v12 = vpack.c.bf16 %v729_v8, %v728_v7  ;;  %v725_v14 = vld [vmem:[%s603_s1] sm:$0xff]  ;;  %v4063_v24 = vmov 1983009808   ;;  %v4064_v27 = vmov 1934713408  }
 0x1b2   : > { %3303 = vmatpush3.bf16.msra.mxu1 %v3302_v9  ;;  %3298 = vmatprep.subr.bf16.mxu0 %v4057_v0  ;;  %v3305_v13 = vpack.c.bf16 %v1121_v11, %v1120_v10  ;;  %v3144_v16 = vld [vmem:[#allocation11] ss:$0 sm:$0xff]  ;;  %v824_v25 = vunpack.c.l.s4 %v4063_v24  ;;  %v856_v28 = vunpack.c.l.s4 %v4064_v27  ;;  %v827_v30 = vshrl.u32 %v826_v26, 7  ;;  %s4065_s20 = smov 16   ;;  %s4066_s22 = smov 8  }
 0x1b3   : > { %3304 = vmatprep.subr.bf16.mxu1 %v4057_v0  ;;  %vm1105_vm2 = vcmask 64512   ;;  %s4067_s9 = smov 32   ;;  %s4069_s5 = smov 24   ;;  %vm1766_vm3 = vcmask 130048   ;;  %vm1768_vm4 = vcmask 195584   ;;  %vm1771_vm5 = vcmask 326656  }
 0x1b4   : > { %v825_v29 = vunpack.c.0.s8 %v824_v25  ;;  %v857_v33 = vunpack.c.0.s8 %v856_v28  ;;  %s4070_s3 = smov 48   ;;  %s4071_s16 = smov 40   ;;  %vm1773_vm6 = vcmask 392192   ;;  %vm1775_vm7 = vcmask 457728  }
 0x1b5   : > { %3300 = vmatpush3.bf16.msra.mxu0 %v3299_v12  ;;  %s4072_s0 = smov 56   ;;  %vm1787_vm8 = vcmask 1043456   ;;  %vm1783_vm9 = vcmask 31744   ;;  %s4073_s1 = smov 96  }
 0x1b6   : > { %3306 = vmatpush3.bf16.msra.mxu1 %v3305_v13  ;;  %3244 = vmatprep.subr.mxu0 %v4059_v1  ;;  %v4646_v34 = vsub.s32 %v825_v29, %v827_v30  ;;  %v4658_v41 = vsub.s32 %v857_v33, %v827_v30  ;;  %s4074_s7 = smov 80   ;;  %s4075_s15 = smov 88  }
 0x1b7   : > { %3234 = vmatprep.subr.mxu1 %v4059_v1  ;;  %p5088_p10 = scmp.ne.s32.totalorder %s5056_s24, 0 }
 0x1b8   : > { %3221 = vmatmul.mubr.msk.f32.vlgmr.msra.gmra.mrb[0].mxu0 %vm737_vm1, %v725_v14 }
 0x1b9   : > { %3232 = vmatmul.mubr.msk.f32.vlgmr.msra.gmra.mrb[0].mxu1 %vm737_vm1, %v725_v14  ;;  %3246 = vmatprep.mubr.msk.f32.mxu0 %vm4058_vm0, %v4059_v1 }
 0x1ba   : > { %3236 = vmatprep.mubr.msk.f32.mxu1 %vm4058_vm0, %v4059_v1 }
 0x28b   : > { %v807_v17 = vpop.f32.mrb[0].mxu0 }
 0x28c   : > { %v4631_v18 = vadd.f32 %v3138_v15, %v807_v17  ;;  %v3222_v19 = vpop.f32.mrb[1].mxu0  ;;  %v1199_v20 = vpop.f32.mrb[0].mxu1 }
 0x28d   : > { %v1200_v21 = vadd.f32 %v3144_v16, %v1199_v20  ;;  %v3233_v22 = vpop.f32.mrb[1].mxu1 }
 0x28e   : > { %818 = vrot.lane.b32.xlu1 %v4631_v18, %s4060_s19  ;;  %812 = vrot.lane.b32.xlu0 %v4631_v18, %s4061_s21 }
 0x28f   : > { %v1203_v23 = vmul.f32 0.35355338, %v1200_v21 }
 0x292   : > { %1205 = vrot.lane.b32.xlu1 %v1203_v23, %s4061_s21  ;;  %815 = vrot.lane.b32.xlu0 %v4631_v18, %s4062_s10 }
 0x296   : > { %1211 = vrot.lane.b32.xlu1 %v1203_v23, %s4060_s19  ;;  %1208 = vrot.lane.b32.xlu0 %v1203_v23, %s4062_s10 }
 0x300   : > { %v4642_v31 = vpop.permute.xlu1 %818  ;;  %v4644_v32 = vpop.permute.xlu0 %812 }
 0x301   : > { %v837_v35 = vcombine.low %v4644_v32, %v4642_v31  ;;  %v838_v36 = vcombine.high %v4644_v32, %v4642_v31 }
 0x303   : > { %v845_v42 = vrot.slane %v837_v35, %v4646_v34  ;;  %v852_v43 = vrot.slane %v838_v36, %v4646_v34 }
 0x304   : > { %v1206_v37 = vpop.permute.xlu1 %1205  ;;  %v4652_v38 = vpop.permute.xlu0 %815 }
 0x305   : > { %v821_v39 = vcombine.low %v4631_v18, %v4652_v38  ;;  %v822_v40 = vcombine.high %v4631_v18, %v4652_v38 }
 0x307   : > { %v829_v44 = vrot.slane %v821_v39, %v4646_v34  ;;  %v836_v45 = vrot.slane %v822_v40, %v4646_v34 }
 0x308   : > { %v1212_v46 = vpop.permute.xlu1 %1211  ;;  %v1209_v47 = vpop.permute.xlu0 %1208 }
 0x309   : > { %v853_v48 = vcombine.low %v829_v44, %v845_v42  ;;  %v854_v49 = vcombine.high %v829_v44, %v845_v42  ;;  %v869_v50 = vcombine.low %v836_v45, %v852_v43  ;;  %v870_v51 = vcombine.high %v836_v45, %v852_v43 }
 0x30a   : > { %v1230_v52 = vcombine.low %v1206_v37, %v1212_v46  ;;  %v1231_v53 = vcombine.high %v1206_v37, %v1212_v46  ;;  %v1214_v54 = vcombine.low %v1203_v23, %v1209_v47  ;;  %v1215_v55 = vcombine.high %v1203_v23, %v1209_v47 }
 0x30b   : > { %v861_v56 = vrot.slane %v853_v48, %v4658_v41  ;;  %v868_v57 = vrot.slane %v854_v49, %v4658_v41  ;;  %v877_v58 = vrot.slane %v869_v50, %v4658_v41  ;;  %v884_v59 = vrot.slane %v870_v51, %v4658_v41 }
 0x30c   : > { %v1238_v60 = vrot.slane %v1230_v52, %v4646_v34  ;;  %v1245_v61 = vrot.slane %v1231_v53, %v4646_v34  ;;  %v1222_v62 = vrot.slane %v1214_v54, %v4646_v34  ;;  %v1229_v63 = vrot.slane %v1215_v55, %v4646_v34 }
 0x30d   : > { %v889_v2 = vcombine.low %v861_v56, %v868_v57  ;;  %v3140_v3 = vcombine.high %v861_v56, %v868_v57  ;;  %v905_v4 = vcombine.low %v877_v58, %v884_v59  ;;  %v3141_v5 = vcombine.high %v877_v58, %v884_v59 }
 0x30e   : > { %v1246_v6 = vcombine.low %v1222_v62, %v1238_v60  ;;  %v1247_v7 = vcombine.high %v1222_v62, %v1238_v60  ;;  %v1262_v8 = vcombine.low %v1229_v63, %v1245_v61  ;;  %v1263_v9 = vcombine.high %v1229_v63, %v1245_v61  ;;  %v1359_v60 = vld [vmem:[%s4586_s28] sm:$0xff]  ;;  %v1361_v61 = vld [vmem:[%s4586_s28 + $0x10] sm:$0xff] }
 0x30f   : > { %v896_v10 = vrot.slane %v889_v2, %v4646_v34  ;;  %v904_v11 = vrot.slane %v3140_v3, %v4646_v34  ;;  %v912_v12 = vrot.slane %v905_v4, %v4646_v34  ;;  %v920_v13 = vrot.slane %v3141_v5, %v4646_v34 }
 0x310   : > { %v1254_v14 = vrot.slane %v1246_v6, %v4658_v41  ;;  %v1261_v15 = vrot.slane %v1247_v7, %v4658_v41  ;;  %v1270_v16 = vrot.slane %v1262_v8, %v4658_v41  ;;  %v1277_v17 = vrot.slane %v1263_v9, %v4658_v41 }
 0x311   : > { %v921_v19 = vcombine.low %v896_v10, %v904_v11  ;;  %v922_v20 = vcombine.high %v896_v10, %v904_v11  ;;  %v937_v21 = vcombine.low %v912_v12, %v920_v13  ;;  %v938_v22 = vcombine.high %v912_v12, %v920_v13  ;;  %v1360_v10 = vld [vmem:[%s4586_s28 + $0x8] sm:$0xff]  ;;  %v1362_v11 = vld [vmem:[%s4586_s28 + $0x18] sm:$0xff]  ;;  %s4076_s28 = smov 72  }
 0x312   : > { %v1282_v23 = vcombine.low %v1254_v14, %v1261_v15  ;;  %v3146_v24 = vcombine.high %v1254_v14, %v1261_v15  ;;  %v1298_v25 = vcombine.low %v1270_v16, %v1277_v17  ;;  %v3147_v26 = vcombine.high %v1270_v16, %v1277_v17 }
 0x313   : > { %v929_v27 = vrot.slane %v921_v19, %v4658_v41  ;;  %v936_v28 = vrot.slane %v922_v20, %v4658_v41  ;;  %v945_v29 = vrot.slane %v937_v21, %v4658_v41  ;;  %v952_v30 = vrot.slane %v938_v22, %v4658_v41 }
 0x314   : > { %v1289_v33 = vrot.slane %v1282_v23, %v4646_v34  ;;  %v1297_v35 = vrot.slane %v3146_v24, %v4646_v34  ;;  %v1305_v36 = vrot.slane %v1298_v25, %v4646_v34  ;;  %v1313_v37 = vrot.slane %v3147_v26, %v4646_v34 }
 0x315   : > { %v953_v39 = vcombine.low %v929_v27, %v945_v29  ;;  %v954_v40 = vcombine.high %v929_v27, %v945_v29  ;;  %v955_v42 = vcombine.low %v936_v28, %v952_v30  ;;  %v956_v43 = vcombine.high %v936_v28, %v952_v30 }
 0x316   : > { %v1314_v44 = vcombine.low %v1289_v33, %v1297_v35  ;;  %v1315_v45 = vcombine.high %v1289_v33, %v1297_v35  ;;  %v1330_v46 = vcombine.low %v1305_v36, %v1313_v37  ;;  %v1331_v47 = vcombine.high %v1305_v36, %v1313_v37 }
 0x317   : > { %1106 = vst.msk [vmem:[#allocation2] sm:$0xff] %vm1105_vm2, %v953_v39  ;;  %1107 = vst.msk [vmem:[#allocation2 + $0x8] sm:$0xff] %vm1105_vm2, %v954_v40  ;;  %v4068_v35 = vmov 0   ;;  %v1777_v39 = vld [vmem:[#allocation17] sm:$0xf] }
 0x318   : > { %1108 = vst.msk [vmem:[#allocation2 + $0x10] sm:$0xff] %vm1105_vm2, %v955_v42  ;;  %1109 = vst.msk [vmem:[#allocation2 + $0x18] sm:$0xff] %vm1105_vm2, %v956_v43  ;;  %v1322_v48 = vrot.slane %v1314_v44, %v4658_v41  ;;  %v1338_v49 = vrot.slane %v1330_v46, %v4658_v41  ;;  %v1329_v50 = vrot.slane %v1315_v45, %v4658_v41  ;;  %3515 = vset.pattern.permute.xlu0 %v4068_v35 }
 0x319   : > { %v1345_v51 = vrot.slane %v1331_v47, %v4658_v41  ;;  %3514 = vset.pattern.permute.xlu1 %v4068_v35 }
 0x31a   : > { %v1346_v54 = vcombine.low %v1322_v48, %v1338_v49  ;;  %v1347_v57 = vcombine.high %v1322_v48, %v1338_v49 }
 0x31b   : > { %v1348_v55 = vcombine.low %v1329_v50, %v1345_v51  ;;  %v1349_v59 = vcombine.high %v1329_v50, %v1345_v51 }
 0x31e   : > { %v1350_v52 = vld [vmem:[#allocation2] sm:$0xff]  ;;  %v1351_v56 = vld [vmem:[#allocation2 + $0x8] sm:$0xff] }
 0x31f   : > { %v1352_v53 = vld [vmem:[#allocation2 + $0x10] sm:$0xff]  ;;  %3235 = vmatpush3.xpose.msk.msra.mxu1 %vm1105_vm2, %v1350_v52  ;;  %v1353_v58 = vld [vmem:[#allocation2 + $0x18] sm:$0xff] }
 0x320   : > { %3245 = vmatpush3.xpose.msk.msra.mxu0 %vm1105_vm2, %v1352_v53  ;;  %3239 = vmatprep.subr.mxu1 %v4059_v1 }
 0x321   : > { %3254 = vmatprep.subr.mxu0 %v4059_v1 }
 0x322   : > { %3237 = vmatmul.mubr.msk.f32.vlgmr.msra.gmra.mrb[2].mxu1 %vm1105_vm2, %v1346_v54 }
 0x323   : > { %3247 = vmatmul.mubr.msk.f32.vlgmr.msra.gmra.mrb[2].mxu0 %vm1105_vm2, %v1348_v55  ;;  %3240 = vmatpush3.xpose.msk.msra.mxu1 %vm1105_vm2, %v1351_v56  ;;  %v1668_v55 = vld [vmem:[#allocation15] sm:$0xf] }
 0x324   : > { %3241 = vmatprep.mubr.msk.f32.mxu1 %vm4058_vm0, %v4059_v1  ;;  %3249 = vmatprep.subr.mxu1 %v4059_v1 }
 0x325   : > { %3256 = vmatprep.mubr.msk.f32.mxu0 %vm4058_vm0, %v4059_v1 }
 0x326   : > { %3242 = vmatmul.mubr.msk.f32.vlgmr.msra.gmra.mrb[4].mxu1 %vm1105_vm2, %v1347_v57 }
 0x327   : > { %3250 = vmatpush3.xpose.msk.msra.mxu1 %vm1105_vm2, %v1353_v58  ;;  %3251 = vmatprep.mubr.msk.f32.mxu1 %vm4058_vm0, %v4059_v1 }
 0x328   : > { %3259 = vmatprep.subr.mxu1 %v4059_v1 }
 0x32a   : > { %3252 = vmatmul.mubr.msk.f32.vlgmr.msra.gmra.mrb[6].mxu1 %vm1105_vm2, %v1349_v59 }
 0x32b   : > { %3261 = vmatprep.mubr.msk.f32.mxu1 %vm4058_vm0, %v4059_v1 }
 0x3f5   : > { %v1436_v62 = vpop.f32.mrb[2].mxu1 }
 0x3f6   : > { %v1588_v63 = vpop.f32.mrb[2].mxu0  ;;  %v1437_v2 = vadd.f32 %v1436_v62, %v1359_v60  ;;  %v3238_v4 = vpop.f32.mrb[3].mxu1 }
 0x3f7   : > { %v1589_v3 = vadd.f32 %v1588_v63, %v1361_v61  ;;  %v3248_v5 = vpop.f32.mrb[3].mxu0 }
 0x3f9   : > { %v1669_v6 = vcombine.low %v1437_v2, %v1589_v3  ;;  %v1670_v7 = vcombine.high %v1437_v2, %v1589_v3  ;;  %v1512_v8 = vpop.f32.mrb[4].mxu1 }
 0x3fa   : > { %v3243_v9 = vpop.f32.mrb[5].mxu1  ;;  %v1513_v13 = vadd.f32 %v1512_v8, %v1360_v10 }
 0x3fb   : > { %v1677_v19 = vrot.slane %v1669_v6, %v4646_v34  ;;  %v1684_v20 = vrot.slane %v1670_v7, %v4646_v34 }
 0x3fd   : > { %v1664_v12 = vpop.f32.mrb[6].mxu1 }
 0x3fe   : > { %v1665_v14 = vadd.f32 %v1664_v12, %v1362_v11  ;;  %v3253_v15 = vpop.f32.mrb[7].mxu1 }
 0x400   : > { %v1685_v16 = vcombine.low %v1513_v13, %v1665_v14  ;;  %v1686_v17 = vcombine.high %v1513_v13, %v1665_v14 }
 0x402   : > { %v1693_v21 = vrot.slane %v1685_v16, %v4646_v34  ;;  %v1700_v22 = vrot.slane %v1686_v17, %v4646_v34 }
 0x404   : > { %v1701_v23 = vcombine.low %v1677_v19, %v1693_v21  ;;  %v1702_v24 = vcombine.high %v1677_v19, %v1693_v21  ;;  %v1717_v25 = vcombine.low %v1684_v20, %v1700_v22  ;;  %v1718_v26 = vcombine.high %v1684_v20, %v1700_v22 }
 0x406   : > { %v1716_v27 = vrot.slane %v1702_v24, %v4658_v41  ;;  %v1709_v28 = vrot.slane %v1701_v23, %v4658_v41  ;;  %v1725_v30 = vrot.slane %v1717_v25, %v4658_v41  ;;  %v1732_v36 = vrot.slane %v1718_v26, %v4658_v41  ;;  %v1951_v23 = vld [vmem:[%s621_s23] sm:$0xff]  ;;  %s4854_s23 = scalar_lea.vmem [#allocation25], %s3124_s25  ;;  %s5086_s25 = sld [smem:[#allocation37_spill]] }
 0x408   : > { %1742 = vrot.lane.b32.xlu1 %v1716_v27, %s4065_s20  ;;  %v1733_v29 = vcombine.high %v1709_v28, %v4059_v1  ;;  %v1734_v33 = vcombine.high %v1716_v27, %v4059_v1  ;;  %v1735_v37 = vcombine.high %v1725_v30, %v4059_v1  ;;  %v1736_v40 = vcombine.high %v1732_v36, %v4059_v1 }
 0x40a   : > { %1738 = vrot.lane.b32.xlu0 %v1733_v29, %s4066_s22 }
 0x40c   : > { %1750 = vrot.lane.b32.xlu1 %v1725_v30, %s4067_s9 }
 0x40e   : > { %1746 = vrot.lane.b32.xlu0 %v1734_v33, %s4069_s5 }
 0x410   : > { %1758 = vrot.lane.b32.xlu1 %v1732_v36, %s4070_s3 }
 0x412   : > { %1754 = vrot.lane.b32.xlu0 %v1735_v37, %s4071_s16 }
 0x414   : > { %1780 = vperm.xlu1 %3514, %v1777_v39  }
 0x416   : > { %1762 = vrot.lane.b32.xlu0 %v1736_v40, %s4072_s0 }
 0x47a   : > { %v1743_v42 = vpop.permute.xlu1 %1742 }
 0x47c   : > { %v1739_v43 = vpop.permute.xlu0 %1738 }
 0x47d   : > { %v1765_v44 = vsel %vm1105_vm2, %v1709_v28, %v1739_v43 }
 0x47e   : > { %v1767_v45 = vsel %vm1766_vm3, %v1765_v44, %v1743_v42  ;;  %v1751_v47 = vpop.permute.xlu1 %1750 }
 0x480   : > { %v1747_v46 = vpop.permute.xlu0 %1746 }
 0x481   : > { %v1769_v48 = vsel %vm1768_vm4, %v1767_v45, %v1747_v46 }
 0x482   : > { %v1770_v49 = vsel %vm737_vm1, %v1769_v48, %v1751_v47  ;;  %v1759_v52 = vpop.permute.xlu1 %1758 }
 0x484   : > { %v1755_v50 = vpop.permute.xlu0 %1754 }
 0x485   : > { %v1772_v51 = vsel %vm1771_vm5, %v1770_v49, %v1755_v50 }
 0x486   : > { %v1774_v53 = vsel %vm1773_vm6, %v1772_v51, %v1759_v52 }
 0x488   : > { %v1763_v54 = vpop.permute.xlu0 %1762 }
 0x489   : > { %v1776_v56 = vsel %vm1775_vm7, %v1774_v53, %v1763_v54 }
 0x48a   : > { %3255 = vmatpush3.msk.msra.mxu0 %vm1787_vm8, %v1776_v56 }
 0x48b   : > { %3257 = vmatmul.mubr.msk.f32.vlgmr.msra.gmra.mrb[4].mxu0 %vm1783_vm9, %v1668_v55  ;;  %3264 = vmatprep.subr.mxu0 %v4059_v1 }
 0x48c   : > { %3266 = vmatprep.mubr.msk.f32.mxu0 %vm4058_vm0, %v4059_v1 }
 0x493   : > { %v1781_v57 = vpop.permute.xlu1 %1780 }
 0x55e   : > { %v1857_v58 = vpop.f32.mrb[4].mxu0 }
 0x55f   : > { %v1858_v59 = vadd.f32 %v1857_v58, %v1781_v57  ;;  %v3258_v60 = vpop.f32.mrb[5].mxu0 }
 0x561   : > { %1865 = vrot.lane.b32.xlu1 %v1858_v59, %s4062_s10  ;;  %1862 = vrot.lane.b32.xlu0 %v1858_v59, %s4061_s21 }
 0x565   : > { %1871 = vrot.lane.b32.xlu1 %v1858_v59, %s4073_s1  ;;  %1868 = vrot.lane.b32.xlu0 %v1858_v59, %s4060_s19 }
 0x569   : > { %1877 = vrot.lane.b32.xlu1 %v1858_v59, %s4074_s7  ;;  %1874 = vrot.lane.b32.xlu0 %v1858_v59, %s4075_s15 }
 0x56d   : > { %1880 = vrot.lane.b32.xlu0 %v1858_v59, %s4076_s28 }
 0x5d3   : > { %v1866_v61 = vpop.permute.xlu1 %1865  ;;  %v1863_v62 = vpop.permute.xlu0 %1862 }
 0x5d4   : > { %v1883_v6 = vcombine.low %v1858_v59, %v1866_v61 }
 0x5d6   : > { %v1890_v10 = vrot.slane %v1883_v6, %v4646_v34 }
 0x5d7   : > { %v1872_v63 = vpop.permute.xlu1 %1871  ;;  %v1869_v2 = vpop.permute.xlu0 %1868 }
 0x5d8   : > { %v1891_v3 = vcombine.low %v1863_v62, %v1869_v2 }
 0x5da   : > { %v1898_v7 = vrot.slane %v1891_v3, %v4646_v34 }
 0x5db   : > { %v1878_v4 = vpop.permute.xlu1 %1877  ;;  %v1875_v5 = vpop.permute.xlu0 %1874 }
 0x5dc   : > { %v1899_v8 = vcombine.low %v1872_v63, %v1878_v4  ;;  %v1915_v12 = vcombine.low %v1890_v10, %v1898_v7  ;;  %v1916_v13 = vcombine.high %v1890_v10, %v1898_v7 }
 0x5de   : > { %v1906_v14 = vrot.slane %v1899_v8, %v4646_v34  ;;  %v1923_v19 = vrot.slane %v1915_v12, %v4658_v41  ;;  %v1930_v21 = vrot.slane %v1916_v13, %v4658_v41 }
 0x5df   : > { %v1881_v9 = vpop.permute.xlu0 %1880 }
 0x5e0   : > { %v1907_v11 = vcombine.low %v1875_v5, %v1881_v9 }
 0x5e2   : > { %v1914_v15 = vrot.slane %v1907_v11, %v4646_v34 }
 0x5e4   : > { %v1931_v16 = vcombine.low %v1906_v14, %v1914_v15  ;;  %v1932_v17 = vcombine.high %v1906_v14, %v1914_v15 }
 0x5e6   : > { %v1939_v20 = vrot.slane %v1931_v16, %v4658_v41  ;;  %v1946_v22 = vrot.slane %v1932_v17, %v4658_v41 }
 0x5e8   : > { %v1948_v24 = vcombine.high %v1923_v19, %v1939_v20  ;;  %v1947_v25 = vcombine.low %v1923_v19, %v1939_v20  ;;  %v1949_v26 = vcombine.low %v1930_v21, %v1946_v22  ;;  %v1950_v27 = vcombine.high %v1930_v21, %v1946_v22 }
 0x5ea   : > { %v1953_v28 = vadd.f32 %v1951_v23, %v1948_v24  ;;  %v1952_v29 = vadd.f32 %v1951_v23, %v1947_v25  ;;  %v1954_v35 = vadd.f32 %v1951_v23, %v1949_v26  ;;  %v1955_v36 = vadd.f32 %v1951_v23, %v1950_v27 }
 0x5ec   : > { %v1959_v30 = vsel %vm1105_vm2, %v1953_v28, -inf  ;;  %v1956_v33 = vsel %vm1105_vm2, %v1952_v29, -inf  ;;  %v1962_v37 = vsel %vm1105_vm2, %v1954_v35, -inf  ;;  %v1965_v39 = vsel %vm1105_vm2, %v1955_v36, -inf }
 0x5ed   : > { %1960 = vmax.xlane.f32.xlu0 %v1959_v30  ;;  %1957 = vmax.xlane.f32.xlu1 %v1956_v33 }
 0x5f1   : > { %1963 = vmax.xlane.f32.xlu0 %v1962_v37  ;;  %1966 = vmax.xlane.f32.xlu1 %v1965_v39 }
 0x67a   : > { %v1961_v40 = vpop.xlane.xlu0 %1960  ;;  %v1958_v42 = vpop.xlane.xlu1 %1957 }
 0x67b   : > { %v1969_v43 = vsub.f32 %v1953_v28, %v1961_v40  ;;  %v1968_v44 = vsub.f32 %v1952_v29, %v1958_v42 }
 0x67d   : > { %v1974_v45 = vmul.f32 1.442695, %v1969_v43  ;;  %v1972_v46 = vmul.f32 1.442695, %v1968_v44 }
 0x67e   : > { %v1964_v47 = vpop.xlane.xlu0 %1963  ;;  %v1967_v48 = vpop.xlane.xlu1 %1966 }
 0x67f   : > { %3516 = vpow2.f32 %v1974_v45  ;;  %v1970_v49 = vsub.f32 %v1954_v35, %v1964_v47  ;;  %v1971_v50 = vsub.f32 %v1955_v36, %v1967_v48  ;;  %v2104_v35 = vld [vmem:[#allocation20] sm:$0xf] }
 0x680   : > { %3518 = vpow2.f32 %v1972_v46 }
 0x681   : > { %v1976_v51 = vmul.f32 1.442695, %v1970_v49  ;;  %v1978_v52 = vmul.f32 1.442695, %v1971_v50 }
 0x683   : > { %3520 = vpow2.f32 %v1976_v51 }
 0x684   : > { %3522 = vpow2.f32 %v1978_v52 }
 0x689   : > { %v3517_v53 = vpop.eup %3516 }
 0x68a   : > { %v3519_v54 = vpop.eup %3518  ;;  %v1983_v55 = vsel %vm1105_vm2, %v3517_v53, 0.0 }
 0x68b   : > { %1984 = vadd.xlane.f32.xlu1 %v1983_v55  ;;  %v1980_v56 = vsel %vm1105_vm2, %v3519_v54, 0.0 }
 0x68c   : > { %1981 = vadd.xlane.f32.xlu0 %v1980_v56 }
 0x68d   : > { %v3521_v57 = vpop.eup %3520 }
 0x68e   : > { %v3523_v58 = vpop.eup %3522  ;;  %v1986_v59 = vsel %vm1105_vm2, %v3521_v57, 0.0 }
 0x68f   : > { %v1989_v60 = vsel %vm1105_vm2, %v3523_v58, 0.0 }
 0x690   : > { %1987 = vadd.xlane.f32.xlu0 %v1986_v59  ;;  %1990 = vadd.xlane.f32.xlu1 %v1989_v60 }
 0x718   : > { %v1985_v61 = vpop.xlane.xlu1 %1984 }
 0x719   : > { %v1982_v62 = vpop.xlane.xlu0 %1981 }
 0x71a   : > { %3524 = vrcp.f32 %v1982_v62 }
 0x71b   : > { %3526 = vrcp.f32 %v1985_v61 }
 0x71d   : > { %v1988_v63 = vpop.xlane.xlu0 %1987  ;;  %v1991_v2 = vpop.xlane.xlu1 %1990 }
 0x71e   : > { %3528 = vrcp.f32 %v1988_v63 }
 0x71f   : > { %3530 = vrcp.f32 %v1991_v2 }
 0x724   : > { %v3525_v3 = vpop.eup %3524 }
 0x725   : > { %v3527_v4 = vpop.eup %3526  ;;  %v1993_v7 = vmul.f32 %v3525_v3, %v3519_v54 }
 0x726   : > { %v1995_v9 = vmul.f32 %v3527_v4, %v3517_v53 }
 0x728   : > { %v3529_v5 = vpop.eup %3528 }
 0x729   : > { %v3531_v6 = vpop.eup %3530  ;;  %v1997_v8 = vmul.f32 %v3529_v5, %v3521_v57 }
 0x72a   : > { %v1999_v10 = vmul.f32 %v3531_v6, %v3523_v58 }
 0x72b   : > { %v2001_v11 = vcombine.low %v1993_v7, %v1997_v8  ;;  %v2002_v12 = vcombine.high %v1993_v7, %v1997_v8 }
 0x72c   : > { %v2017_v13 = vcombine.low %v1995_v9, %v1999_v10  ;;  %v2018_v14 = vcombine.high %v1995_v9, %v1999_v10 }
 0x72d   : > { %v2009_v15 = vrot.slane %v2001_v11, %v4646_v34  ;;  %v2016_v17 = vrot.slane %v2002_v12, %v4646_v34 }
 0x72e   : > { %v2025_v16 = vrot.slane %v2017_v13, %v4646_v34  ;;  %v2032_v19 = vrot.slane %v2018_v14, %v4646_v34 }
 0x730   : > { %v2034_v20 = vcombine.high %v2009_v15, %v2025_v16  ;;  %v2033_v21 = vcombine.low %v2009_v15, %v2025_v16  ;;  %v2049_v24 = vcombine.low %v2016_v17, %v2032_v19  ;;  %v2050_v28 = vcombine.high %v2016_v17, %v2032_v19 }
 0x732   : > { %v2048_v22 = vrot.slane %v2034_v20, %v4658_v41  ;;  %v2041_v23 = vrot.slane %v2033_v21, %v4658_v41  ;;  %v2057_v27 = vrot.slane %v2049_v24, %v4658_v41  ;;  %v2064_v30 = vrot.slane %v2050_v28, %v4658_v41 }
 0x734   : > { %2074 = vrot.lane.b32.xlu1 %v2048_v22, %s4065_s20  ;;  %v2065_v25 = vcombine.high %v2041_v23, %v4059_v1  ;;  %v2066_v26 = vcombine.high %v2048_v22, %v4059_v1  ;;  %v2067_v29 = vcombine.high %v2057_v27, %v4059_v1  ;;  %v2068_v33 = vcombine.high %v2064_v30, %v4059_v1 }
 0x736   : > { %2070 = vrot.lane.b32.xlu0 %v2065_v25, %s4066_s22 }
 0x738   : > { %2078 = vrot.lane.b32.xlu1 %v2066_v26, %s4069_s5 }
 0x73a   : > { %2082 = vrot.lane.b32.xlu0 %v2057_v27, %s4067_s9  ;;  %s5087_s9 = sld [smem:[#allocation52_spill]] }
 0x73c   : > { %2086 = vrot.lane.b32.xlu1 %v2067_v29, %s4071_s16 }
 0x73e   : > { %2090 = vrot.lane.b32.xlu0 %v2064_v30, %s4070_s3 }
 0x740   : > { %2094 = vrot.lane.b32.xlu1 %v2068_v33, %s4072_s0  ;;  %s4077_s0 = smov [#allocation25]  }
 0x742   : > { %2107 = vperm.xlu0 %3515, %v2104_v35  }
 0x744   : > { %957 = vrot.lane.b32.xlu1 %v4631_v18, %s4073_s1 }
 0x746   : > { %961 = vrot.lane.b32.xlu0 %v4652_v38, %s4073_s1 }
 0x748   : > { %959 = vrot.lane.b32.xlu1 %v4644_v32, %s4073_s1 }
 0x74c   : > { %963 = vrot.lane.b32.xlu1 %v4642_v31, %s4073_s1  ;;  %v2000_v31 = vld [vmem:[#allocation18] sm:$0xf] }
 0x7a6   : > { %v2075_v36 = vpop.permute.xlu1 %2074 }
 0x7a8   : > { %v2071_v37 = vpop.permute.xlu0 %2070 }
 0x7a9   : > { %v2097_v39 = vsel %vm1105_vm2, %v2041_v23, %v2071_v37 }
 0x7aa   : > { %v2079_v40 = vpop.permute.xlu1 %2078  ;;  %v2098_v42 = vsel %vm1766_vm3, %v2097_v39, %v2075_v36 }
 0x7ab   : > { %v2099_v43 = vsel %vm1768_vm4, %v2098_v42, %v2079_v40 }
 0x7ac   : > { %v2083_v44 = vpop.permute.xlu0 %2082 }
 0x7ad   : > { %v2100_v18 = vsel %vm737_vm1, %v2099_v43, %v2083_v44 }
 0x7ae   : > { %v2087_v45 = vpop.permute.xlu1 %2086 }
 0x7af   : > { %v2101_v38 = vsel %vm1771_vm5, %v2100_v18, %v2087_v45 }
 0x7b0   : > { %v2091_v46 = vpop.permute.xlu0 %2090 }
 0x7b1   : > { %v2102_v32 = vsel %vm1773_vm6, %v2101_v38, %v2091_v46 }
 0x7b2   : > { %v2095_v47 = vpop.permute.xlu1 %2094 }
 0x7b3   : > { %v2103_v48 = vsel %vm1775_vm7, %v2102_v32, %v2095_v47 }
 0x7b4   : > { %3260 = vmatpush3.msk.msra.mxu1 %vm1787_vm8, %v2103_v48 }
 0x7b5   : > { %3262 = vmatmul.mubr.msk.f32.vlgmr.msra.gmra.mrb[8].mxu1 %vm1783_vm9, %v2000_v31  ;;  %3269 = vmatprep.subr.mxu1 %v4059_v1 }
 0x7b6   : > { %v958_v49 = vpop.permute.xlu1 %957  ;;  %3271 = vmatprep.mubr.msk.f32.mxu1 %vm4058_vm0, %v4059_v1 }
 0x7ba   : > { %v960_v50 = vpop.permute.xlu1 %959 }
 0x7be   : > { %v964_v51 = vpop.permute.xlu1 %963 }
 0x7bf   : > { %v985_v53 = vcombine.low %v960_v50, %v964_v51  ;;  %v986_v54 = vcombine.high %v960_v50, %v964_v51 }
 0x7c1   : > { %v2108_v52 = vpop.permute.xlu0 %2107  ;;  %v993_v58 = vrot.slane %v985_v53, %v4646_v34  ;;  %v1000_v59 = vrot.slane %v986_v54, %v4646_v34 }
 0x7c5   : > { %v962_v55 = vpop.permute.xlu0 %961 }
 0x7c6   : > { %v969_v56 = vcombine.low %v958_v49, %v962_v55  ;;  %v970_v57 = vcombine.high %v958_v49, %v962_v55 }
 0x7c8   : > { %v977_v60 = vrot.slane %v969_v56, %v4646_v34  ;;  %v984_v61 = vrot.slane %v970_v57, %v4646_v34 }
 0x7ca   : > { %v1001_v62 = vcombine.low %v977_v60, %v993_v58  ;;  %v1002_v63 = vcombine.high %v977_v60, %v993_v58  ;;  %v1017_v2 = vcombine.low %v984_v61, %v1000_v59  ;;  %v1018_v3 = vcombine.high %v984_v61, %v1000_v59 }
 0x7cc   : > { %v1009_v4 = vrot.slane %v1001_v62, %v4658_v41  ;;  %v1016_v5 = vrot.slane %v1002_v63, %v4658_v41  ;;  %v1025_v6 = vrot.slane %v1017_v2, %v4658_v41  ;;  %v1032_v7 = vrot.slane %v1018_v3, %v4658_v41  ;;  %v2723_v2 = vld [vmem:[#allocation21] sm:$0xff]  ;;  %v2724_v3 = vld [vmem:[#allocation21 + $0x8] sm:$0xff] }
 0x7ce   : > { %v1037_v8 = vcombine.low %v1009_v4, %v1016_v5  ;;  %v3142_v9 = vcombine.high %v1009_v4, %v1016_v5  ;;  %v1053_v10 = vcombine.low %v1025_v6, %v1032_v7  ;;  %v3143_v11 = vcombine.high %v1025_v6, %v1032_v7 }
 0x7cf   : > { %v3308_v4 = vpack.c.bf16 %v2724_v3, %v2723_v2 }
 0x7d0   : > { %v1044_v12 = vrot.slane %v1037_v8, %v4646_v34  ;;  %v1052_v13 = vrot.slane %v3142_v9, %v4646_v34  ;;  %v1060_v14 = vrot.slane %v1053_v10, %v4646_v34  ;;  %v1068_v15 = vrot.slane %v3143_v11, %v4646_v34 }
 0x7d2   : > { %v1069_v16 = vcombine.low %v1044_v12, %v1052_v13  ;;  %v1070_v17 = vcombine.high %v1044_v12, %v1052_v13  ;;  %v1085_v19 = vcombine.low %v1060_v14, %v1068_v15  ;;  %v1086_v20 = vcombine.high %v1060_v14, %v1068_v15 }
 0x7d4   : > { %v1077_v21 = vrot.slane %v1069_v16, %v4658_v41  ;;  %v1084_v22 = vrot.slane %v1070_v17, %v4658_v41  ;;  %v1093_v23 = vrot.slane %v1085_v19, %v4658_v41  ;;  %v1100_v24 = vrot.slane %v1086_v20, %v4658_v41 }
 0x7d6   : > { %v1101_v25 = vcombine.low %v1077_v21, %v1093_v23  ;;  %v1102_v26 = vcombine.high %v1077_v21, %v1093_v23  ;;  %v1103_v27 = vcombine.low %v1084_v22, %v1100_v24  ;;  %v1104_v28 = vcombine.high %v1084_v22, %v1100_v24  ;;  %v2725_v24 = vld [vmem:[#allocation21 + $0x10] sm:$0xff] }
 0x7d8   : > { %1111 = vst.msk [vmem:[#allocation2 + $0x20] sm:$0xff] %vm1105_vm2, %v1101_v25  ;;  %1112 = vst.msk [vmem:[#allocation2 + $0x28] sm:$0xff] %vm1105_vm2, %v1102_v26  ;;  %v2726_v25 = vld [vmem:[#allocation21 + $0x18] sm:$0xff] }
 0x7d9   : > { %1113 = vst.msk [vmem:[#allocation2 + $0x30] sm:$0xff] %vm1105_vm2, %v1103_v27  ;;  %1114 = vst.msk [vmem:[#allocation2 + $0x38] sm:$0xff] %vm1105_vm2, %v1104_v28 }
 0x7df   : > { %v1355_v29 = vld [vmem:[#allocation2 + $0x20] sm:$0xff]  ;;  %v1356_v30 = vld [vmem:[#allocation2 + $0x28] sm:$0xff] }
 0x7e0   : > { %3265 = vmatpush3.msra.mxu0 %v1355_v29  ;;  %3270 = vmatpush3.msra.mxu1 %v1356_v30  ;;  %v1357_v62 = vld [vmem:[#allocation2 + $0x30] sm:$0xff]  ;;  %v1358_v63 = vld [vmem:[#allocation2 + $0x38] sm:$0xff]  ;;  %v3311_v30 = vpack.c.bf16 %v2726_v25, %v2725_v24 }
 0x7e1   : > { %3274 = vmatprep.subr.mxu0 %v4059_v1  ;;  %3279 = vmatprep.subr.mxu1 %v4059_v1 }
 0x888   : > { %v2182_v33 = vpop.f32.mrb[8].mxu1 }
 0x889   : > { %v2183_v35 = vadd.f32 %v2182_v33, %v2108_v52  ;;  %v3263_v36 = vpop.f32.mrb[9].mxu1 }
 0x88b   : > { %2190 = vrot.lane.b32.xlu1 %v2183_v35, %s4062_s10  ;;  %2187 = vrot.lane.b32.xlu0 %v2183_v35, %s4061_s21  ;;  %s2842_s21 = sshll.u32 %s4854_s23, 4  ;;  %s4906_s21 = int_to_ptr.vmem [resolvable:$true] %s2842_s21 }
 0x88c   : > { %s3902_s16 = scalar_lea.vmem %s4906_s21, 512 }
 0x88d   : > { %p3903_p3 = scmp.ne.s32.totalorder %s4906_s21, %s3902_s16 }
 0x88f   : > { %2196 = vrot.lane.b32.xlu1 %v2183_v35, %s4073_s1  ;;  %2193 = vrot.lane.b32.xlu0 %v2183_v35, %s4060_s19  ;;  %s3176_s19 = sshll.u32 %s5086_s25, 9  ;;  %p3904_p9 = pnand %p3903_p3, %p5088_p10 }
 0x890   : > { %s4904_s3 = scalar_lea.hbm %s5087_s9, %s3176_s19  ;;  %s3906_s1 = sshll.u32 %s4077_s0, 4  ;;  %s3907_s1 = int_to_ptr.vmem [resolvable:$false] %s3906_s1 }
 0x891   : > { %p3905_p5 = pneg %p3904_p9  ;;  %p3909_p12 = scmp.lt.s32.totalorder %s4906_s21, %s3907_s1 }
 0x893   : > { %2202 = vrot.lane.b32.xlu1 %v2183_v35, %s4074_s7  ;;  %2199 = vrot.lane.b32.xlu0 %v2183_v35, %s4075_s15  ;;  %s3908_s7 = scalar_lea.vmem %s3907_s1, 1024 }
 0x894   : > { %p3910_p13 = scmp.lt.s32.totalorder %s3908_s7, %s3902_s16 }
 0x896   : > { %p3911_p4 = por %p3910_p13, %p3909_p12 }
 0x897   : > { %2205 = vrot.lane.b32.xlu0 %v2183_v35, %s4076_s28 }
 0x898   : > { %p3912_p7 = pnand %p3911_p4, %p3905_p5 }
 0x8fd   : > { %v2191_v37 = vpop.permute.xlu1 %2190  ;;  %v2188_v39 = vpop.permute.xlu0 %2187 }
 0x8fe   : > { %v2208_v45 = vcombine.low %v2183_v35, %v2191_v37 }
 0x900   : > { %v2215_v47 = vrot.slane %v2208_v45, %v4646_v34 }
 0x901   : > { %v2197_v40 = vpop.permute.xlu1 %2196  ;;  %v2194_v42 = vpop.permute.xlu0 %2193 }
 0x902   : > { %v2216_v43 = vcombine.low %v2188_v39, %v2194_v42 }
 0x904   : > { %v2223_v38 = vrot.slane %v2216_v43, %v4646_v34 }
 0x905   : > { %v2203_v44 = vpop.permute.xlu1 %2202  ;;  %v2200_v18 = vpop.permute.xlu0 %2199 }
 0x906   : > { %v2224_v46 = vcombine.low %v2197_v40, %v2203_v44  ;;  %v2240_v48 = vcombine.low %v2215_v47, %v2223_v38  ;;  %v2241_v49 = vcombine.high %v2215_v47, %v2223_v38 }
 0x908   : > { %v2231_v50 = vrot.slane %v2224_v46, %v4646_v34  ;;  %v2248_v54 = vrot.slane %v2240_v48, %v4658_v41  ;;  %v2255_v55 = vrot.slane %v2241_v49, %v4658_v41 }
 0x909   : > { %v2206_v32 = vpop.permute.xlu0 %2205 }
 0x90a   : > { %v2232_v31 = vcombine.low %v2200_v18, %v2206_v32 }
 0x90c   : > { %v2239_v51 = vrot.slane %v2232_v31, %v4646_v34 }
 0x90e   : > { %v2256_v52 = vcombine.low %v2231_v50, %v2239_v51  ;;  %v2257_v53 = vcombine.high %v2231_v50, %v2239_v51 }
 0x910   : > { %v2264_v56 = vrot.slane %v2256_v52, %v4658_v41  ;;  %v2271_v57 = vrot.slane %v2257_v53, %v4658_v41 }
 0x912   : > { %v2272_v58 = vcombine.low %v2248_v54, %v2264_v56  ;;  %v2273_v59 = vcombine.high %v2248_v54, %v2264_v56  ;;  %v2274_v60 = vcombine.low %v2255_v55, %v2271_v57  ;;  %v2275_v61 = vcombine.high %v2255_v55, %v2271_v57 }
 0x914   : > { %2276 = vst.msk [vmem:[%s4854_s23] sm:$0xff] %vm1105_vm2, %v2272_v58  ;;  %2277 = vst.msk [vmem:[%s4854_s23 + $0x8] sm:$0xff] %vm1105_vm2, %v2273_v59  ;;  %3267 = vmatmul.mubr.msk.f32.vlgmr.msra.gmra.mrb[6].mxu0 %vm1105_vm2, %v2272_v58  ;;  %3272 = vmatmul.mubr.msk.f32.vlgmr.msra.gmra.mrb[10].mxu1 %vm1105_vm2, %v2273_v59 }
 0x915   : > { %2278 = vst.msk [vmem:[%s4854_s23 + $0x10] sm:$0xff] %vm1105_vm2, %v2274_v60  ;;  %2279 = vst.msk [vmem:[%s4854_s23 + $0x18] sm:$0xff] %vm1105_vm2, %v2275_v61  ;;  %3275 = vmatpush3.msra.mxu0 %v1357_v62  ;;  %3280 = vmatpush3.msra.mxu1 %v1358_v63 }
 0x916   : > { %3276 = vmatprep.mubr.msk.f32.mxu0 %vm4058_vm0, %v4059_v1  ;;  %3281 = vmatprep.mubr.msk.f32.mxu1 %vm4058_vm0, %v4059_v1 }
 0x917   : > { %3307 = vmatprep.subr.bf16.mxu0 %v4057_v0 }
 0x918   : > { %3277 = vmatmul.mubr.msk.f32.vlgmr.msra.gmra.mrb[8].mxu0 %vm1105_vm2, %v2274_v60  ;;  %3282 = vmatmul.mubr.msk.f32.vlgmr.msra.gmra.mrb[12].mxu1 %vm1105_vm2, %v2275_v61 }
 0x919   : > { %3292 = vmatprep.mubr.msk.f32.mxu0 %vm4058_vm0, %v4059_v1  ;;  %3309 = vmatpush3.bf16.msra.mxu0 %v3308_v4 }
 0x91a   : > { %3310 = vmatprep.subr.bf16.mxu0 %v4057_v0 }
 0x91d   : > { %3312 = vmatpush3.bf16.msra.mxu0 %v3311_v30 }
 0x9e7   : > { %v2349_v5 = vpop.f32.mrb[6].mxu0  ;;  %v2422_v6 = vpop.f32.mrb[10].mxu1 }
 0x9e8   : > { %v3268_v7 = vpop.f32.mrb[7].mxu0  ;;  %v3273_v8 = vpop.f32.mrb[11].mxu1 }
 0x9eb   : > { %v2495_v9 = vpop.f32.mrb[8].mxu0  ;;  %v2568_v10 = vpop.f32.mrb[12].mxu1 }
 0x9ec   : > { %v2572_v11 = vcombine.low %v2349_v5, %v2495_v9  ;;  %v2573_v12 = vcombine.high %v2349_v5, %v2495_v9  ;;  %v2588_v13 = vcombine.low %v2422_v6, %v2568_v10  ;;  %v2589_v14 = vcombine.high %v2422_v6, %v2568_v10  ;;  %v3278_v15 = vpop.f32.mrb[9].mxu0  ;;  %v3283_v16 = vpop.f32.mrb[13].mxu1 }
 0x9ee   : > { %v2580_v1 = vrot.slane %v2572_v11, %v4646_v34  ;;  %v2587_v17 = vrot.slane %v2573_v12, %v4646_v34  ;;  %v2596_v19 = vrot.slane %v2588_v13, %v4646_v34  ;;  %v2603_v0 = vrot.slane %v2589_v14, %v4646_v34 }
 0x9f0   : > { %v2604_v20 = vcombine.low %v2580_v1, %v2596_v19  ;;  %v2605_v21 = vcombine.high %v2580_v1, %v2596_v19  ;;  %v2620_v22 = vcombine.low %v2587_v17, %v2603_v0  ;;  %v2621_v23 = vcombine.high %v2587_v17, %v2603_v0 }
 0x9f2   : > { %v2612_v26 = vrot.slane %v2604_v20, %v4658_v41  ;;  %v2619_v27 = vrot.slane %v2605_v21, %v4658_v41  ;;  %v2628_v28 = vrot.slane %v2620_v22, %v4658_v41  ;;  %v2635_v29 = vrot.slane %v2621_v23, %v4658_v41 }
 0x9f4   : > { %v2640_v33 = vcombine.low %v2612_v26, %v2619_v27  ;;  %v3164_v35 = vcombine.high %v2612_v26, %v2619_v27  ;;  %v2656_v36 = vcombine.low %v2628_v28, %v2635_v29  ;;  %v3165_v37 = vcombine.high %v2628_v28, %v2635_v29 }
 0x9f6   : > { %v2647_v39 = vrot.slane %v2640_v33, %v4646_v34  ;;  %v2655_v40 = vrot.slane %v3164_v35, %v4646_v34  ;;  %v2663_v42 = vrot.slane %v2656_v36, %v4646_v34  ;;  %v2671_v43 = vrot.slane %v3165_v37, %v4646_v34 }
 0x9f8   : > { %v2673_v44 = vcombine.high %v2647_v39, %v2655_v40  ;;  %v2689_v18 = vcombine.high %v2663_v42, %v2671_v43  ;;  %v2672_v45 = vcombine.low %v2647_v39, %v2655_v40  ;;  %v2688_v38 = vcombine.low %v2663_v42, %v2671_v43 }
 0x9fa   : > { %v2687_v46 = vrot.slane %v2673_v44, %v4658_v41  ;;  %v2703_v32 = vrot.slane %v2689_v18, %v4658_v41  ;;  %v2680_v47 = vrot.slane %v2672_v45, %v4658_v41  ;;  %v2696_v31 = vrot.slane %v2688_v38, %v4658_v41 }
 0x9fc   : > { %v2706_v48 = vcombine.low %v2687_v46, %v2703_v32  ;;  %v2705_v49 = vcombine.high %v2680_v47, %v2696_v31  ;;  %v2707_v50 = vcombine.high %v2687_v46, %v2703_v32  ;;  %v2704_v51 = vcombine.low %v2680_v47, %v2696_v31 }
 0x9fe   : > { %2713 = vrot.lane.b32.xlu0 %v2706_v48, %s4065_s20  ;;  %2709 = vrot.lane.b32.xlu1 %v2705_v49, %s4066_s22 }
 0xa02   : > { %2717 = vrot.lane.b32.xlu1 %v2707_v50, %s4069_s5  ;;  %s2814_s5 = scalar_lea.sflag [#allocation26], %s4571_s11 }
 0xa70   : > { %v2710_v34 = vpop.permute.xlu1 %2709  ;;  %v2714_v52 = vpop.permute.xlu0 %2713 }
 0xa71   : > { %v2720_v53 = vsel %vm1105_vm2, %v2704_v51, %v2710_v34 }
 0xa72   : > { %v2721_v41 = vsel %vm1766_vm3, %v2720_v53, %v2714_v52 }
 0xa74   : > { %v2718_v54 = vpop.permute.xlu1 %2717 }
 0xa75   : > { %v2722_v55 = vsel %vm1768_vm4, %v2721_v41, %v2718_v54 }
 0xa76   : > { %3293 = vmatmul.mubr.msk.f32.vlgmr.msra.gmra.mrb[10].mxu0 %vm737_vm1, %v2722_v55 }
 0xa77   : > { %3915 = shalt.err (!%p3912_p7)
}
 0xa78   : > { %s3916_s15 = scalar_lea.hbm %s4904_s3, 512  ;;  %s3920_s19 = scalar_lea.hbm %s5087_s9, 1024 }
 0xa79   : > { %p3917_p2 = scmp.ne.s32.totalorder %s4904_s3, %s3916_s15  ;;  %p3921_p11 = scmp.lt.u32.totalorder %s4904_s3, %s5087_s9 }
 0xa7a   : > { %p3922_p1 = scmp.lt.u32.totalorder %s3920_s19, %s3916_s15  ;;  %p3924_p3 = scmp.lt.u32.totalorder %s3916_s15, %s4904_s3 }
 0xa7b   : > { %p3918_p8 = pnand %p3917_p2, %p5088_p10 }
 0xa7c   : > { %p3923_p0 = por %p3922_p1, %p3921_p11 }
 0xa7d   : > { %p3919_p6 = pneg %p3918_p8 }
 0xa7e   : > { %p3925_p9 = por %p3924_p3, %p3923_p0 }
 0xa80   : > { %p3926_p5 = pnand %p3925_p9, %p3919_p6 }
 0xa82   : > { %3929 = shalt.err (!%p3926_p5)
}
 0xa83   : > { %s4078_s16 = smov 128   ;;  %v3166_v56 = vld [vmem:[#allocation23] ss:$0 sm:$0xff]  ;;  %s3170_s0 = sshll.u32 %s5086_s25, 7 }
 0xa84   : > { %3360 = dma.vmem_to_hbm [thread:$0]  (%p5088_p10), %s4906_s21, 512, %s4904_s3, %s2814_s5, %s4078_s16, %s4078_s16, %s4066_s22  }
 0xa85   : > { %s713_s1 = scalar_lea.vmem [#allocation24], %s4574_s12  ;;  %s5089_s23 = sld [smem:[#allocation51_spill]] }
 0xa86   : > { %s2828_s7 = sshll.u32 %s713_s1, 4  ;;  %s2809_s22 = scalar_lea.sflag [#allocation5], %s4571_s11  ;;  %s4940_s7 = int_to_ptr.vmem [resolvable:$true] %s2828_s7 }
 0xa87   : > { %s3930_s21 = scalar_lea.vmem %s4940_s7, 128  ;;  %s4079_s12 = smov [#allocation24]  }
 0xa88   : > { %p3931_p12 = scmp.ne.s32.totalorder %s4940_s7, %s3930_s21  ;;  %s3934_s25 = sshll.u32 %s4079_s12, 4  ;;  %s3935_s25 = int_to_ptr.vmem [resolvable:$false] %s3934_s25 }
 0xa89   : > { %s3936_s3 = scalar_lea.vmem %s3935_s25, 256  ;;  %p3937_p7 = scmp.lt.s32.totalorder %s4940_s7, %s3935_s25 }
 0xa8a   : > { %p3932_p13 = pnand %p3931_p12, %p5088_p10  ;;  %p3938_p2 = scmp.lt.s32.totalorder %s3936_s3, %s3930_s21 }
 0xa8b   : > { %s4938_s19 = scalar_lea.hbm %s5089_s23, %s3170_s0 }
 0xa8c   : > { %p3933_p4 = pneg %p3932_p13  ;;  %p3939_p8 = por %p3938_p2, %p3937_p7 }
 0xa8e   : > { %p3940_p6 = pnand %p3939_p8, %p3933_p4 }
 0xb49   : > { %v2803_v57 = vpop.f32.mrb[10].mxu0 }
 0xb4a   : > { %v2804_v58 = vadd.f32 %v3166_v56, %v2803_v57  ;;  %v3294_v59 = vpop.f32.mrb[11].mxu0 }
 0xb4c   : > { %2807 = vst.msk [vmem:[%s713_s1] sm:$0xff] %vm737_vm1, %v2804_v58 }
 0xb4d   : > { %3943 = shalt.err (!%p3940_p6)
}
 0xb4e   : > { %s3944_s11 = scalar_lea.hbm %s4938_s19, 128  ;;  %s3948_s20 = scalar_lea.hbm %s5089_s23, 256 }
 0xb4f   : > { %p3945_p11 = scmp.ne.s32.totalorder %s4938_s19, %s3944_s11  ;;  %p3949_p3 = scmp.lt.u32.totalorder %s4938_s19, %s5089_s23 }
 0xb50   : > { %p3950_p9 = scmp.lt.u32.totalorder %s3948_s20, %s3944_s11  ;;  %p3952_p12 = scmp.lt.u32.totalorder %s3944_s11, %s4938_s19 }
 0xb51   : > { %p3946_p1 = pnand %p3945_p11, %p5088_p10 }
 0xb52   : > { %p3951_p5 = por %p3950_p9, %p3949_p3 }
 0xb53   : > { %p3947_p0 = pneg %p3946_p1 }
 0xb54   : > { %p3953_p13 = por %p3952_p12, %p3951_p5 }
 0xb56   : > { %p3954_p4 = pnand %p3953_p13, %p3947_p0 }
 0xb58   : > { %3957 = shalt.err (!%p3954_p4)
}
 0xb59   : > { %3359 = dma.vmem_to_hbm [thread:$0]  (%p5088_p10), %s4940_s7, 128, %s4938_s19, %s2809_s22  }
 0xb5a PF: > { %s2857_s1 = sand.u32 1, %s4020_s29   ;;  %p5090_p7 = scmp.ne.s32.totalorder %s5058_s14, 0 }
 0xb5b   : > { %p5091_p2 = scmp.ge.s32.totalorder %s4040_s18, 2  ;;  %s2858_s15 = scalar_lea.sflag [#allocation5], %s2857_s1 }
 0xb5d   : > { %p3405_p8 = pnand %p5091_p2, %p5090_p7 }
 0xb5f   : > { %4011 = dma.done.wait (!%p3405_p8), %s2858_s15, 128  }
 0xb60   : > { %4013 = vsyncadd (!%p3405_p8), %s2858_s15, 4294967168  ;;  %s2867_s28 = scalar_lea.sflag [#allocation26], %s2857_s1 }
 0xb61   : > { %4015 = dma.done.wait (!%p3405_p8), %s2867_s28, 512  }
 0xb62   : > { %4017 = vsyncadd (!%p3405_p8), %s2867_s28, 4294966784  ;;  %s42_s18 = sadd.s32 1, %s4040_s18   ;;  %s5092_s24 = sld [smem:[#allocation36_spill]] }
 0xb63   : > { %p39_p6 = scmp.ge.s32.totalorder %s42_s18, 4   ;;  %s5093_s15 = sld [smem:[#allocation40_spill]] }
 0xb64   : > { %s5094_s7 = sld [smem:[#allocation39_spill]]  ;;  %s5095_s29 = smov %s4024_s30 }
 0xb65   : > { %s5097_s16 = smov %s4036_s17  ;;  %41 = sbr.rel (!%p39_p6) target bundleno = 28 (0x1c), region = 205 }
 0xb68   : > { %s5096_s30 = smov %s5092_s24 }
 0xb6a   : > { %s5098_s17 = smov %s5094_s7 }
 0xb6c   :  { %2872 = vsyncpa [#allocation4], 1 }
 0xb6d   :  { %2874 = vsyncpa [#allocation4 + $0x1], 1 }
 0xb6e   :  { %2875 = vsyncpa [#allocation7], 1 }
 0xb6f   :  { %2877 = vsyncpa [#allocation7 + $0x1], 1 }
 0xb70   :  { %2878 = vsyncpa [#allocation10], 1 }
 0xb71   :  { %2879 = vsyncpa [#allocation13], 1 }
 0xb72   :  { %2880 = vsyncpa [#allocation16], 1 }
 0xb73   :  { %2881 = vsyncpa [#allocation19], 1 }
 0xb74   :  { %2882 = vsyncpa [#allocation22], 1 }
 0xb75   :  { %2883 = vsyncpa [#allocation5], 1 }
 0xb76   :  { %2885 = vsyncpa [#allocation5 + $0x1], 1 }
 0xb77   :  { %2886 = vsyncpa [#allocation26], 1 }
 0xb78   :  { %2888 = vsyncpa [#allocation26 + $0x1], 1 }

</bundles_post_ra>
